<compile_context>
chip_gen: v6e
topology: v6e:2x2x1
jax: 0.10.0
libtpu: 0.0.40
codegen_flags: <defaults>
</compile_context>

<pallas_src>
import functools

import jax
import jax.numpy as jnp
from jax import lax
from jax.experimental import pallas as pl
from jax.experimental.pallas import tpu as pltpu


def _round_up(x, m):
    return ((x + m - 1) // m) * m


def _pick_chunk(T, max_chunk=64):
    """Largest divisor of T that is <= max_chunk (keeps VMEM bounded on v7x)."""
    if T <= max_chunk:
        return T
    for c in range(max_chunk, 0, -1):
        if T % c == 0:
            return c
    return T


def lstm_classifier_kernel(
    x_ref,       # (Tc*B, E)  time-major flattened chunk of token embeddings
    img_ref,     # (B, Dv)    image embeddings (padded)
    wih_ref,     # (E, 4H)    input->hidden (transposed, PyTorch gate order i,f,g,o)
    whh_ref,     # (H, 4H)    hidden->hidden (transposed)
    b_ref,       # (1, 4H)    folded b_ih + b_hh
    wcls_ref,    # (H+Dv, C)  classifier weight (transposed, [text; image] rows)
    bcls_ref,    # (1, C)
    out_ref,     # (B, C)     logits (padded)
    h_sc,        # VMEM (B, H) hidden state, persists across chunks
    c_sc,        # VMEM (B, H) cell state, persists across chunks
    gates_sc,    # VMEM (Tc*B, 4H) precomputed input projections for the chunk
    *,
    batch: int,
    chunk_steps: int,
):
    chunk = pl.program_id(0)
    B = batch
    H = h_sc.shape[-1]

    @pl.when(chunk == 0)
    def _init():
        h_sc[...] = jnp.zeros_like(h_sc)
        c_sc[...] = jnp.zeros_like(c_sc)

    # Hoisted input projection: one batched matmul for all timesteps of the
    # chunk (no serial dependence), with the folded bias added once.
    gates_sc[...] = (
        jnp.dot(x_ref[...], wih_ref[...], preferred_element_type=jnp.float32)
        + b_ref[...]
    )

    whh = whh_ref[...]

    def step(t, carry):
        h, c = carry
        row = pl.multiple_of(t * B, B)  # sublane-aligned dynamic slice
        gates = gates_sc[pl.ds(row, B), :] + jnp.dot(
            h, whh, preferred_element_type=jnp.float32
        )
        # H is padded to a lane multiple -> these slices are free views.
        i_g = jax.nn.sigmoid(gates[:, 0 * H:1 * H])
        f_g = jax.nn.sigmoid(gates[:, 1 * H:2 * H])
        g_g = jnp.tanh(gates[:, 2 * H:3 * H])
        o_g = jax.nn.sigmoid(gates[:, 3 * H:4 * H])
        c = f_g * c + i_g * g_g
        h = o_g * jnp.tanh(c)
        return h, c

    h, c = lax.fori_loop(
        0, chunk_steps, step, (h_sc[...], c_sc[...]), unroll=True
    )
    h_sc[...] = h
    c_sc[...] = c

    @pl.when(chunk == pl.num_programs(0) - 1)
    def _epilogue():
        # Dropout(p=0) is identity; concat + Linear as a single matmul
        # (both halves are lane-aligned so the concat is free).
        feats = jnp.concatenate([h, img_ref[...]], axis=-1)
        out_ref[...] = (
            jnp.dot(feats, wcls_ref[...], preferred_element_type=jnp.float32)
            + bcls_ref[...]
        ).astype(out_ref.dtype)


def my_lstm_model_forward(x_bte, img, params):
    """x_bte: [B, T, E] token embeddings (batch_first). img: [B, Dv].

    params use PyTorch layouts:
      w_ih (4H, E), w_hh (4H, H), b_ih (4H,), b_hh (4H,),
      w_cls (C, H+Dv), b_cls (C,)   (gate order i, f, g, o)
    """
    B, T, E = x_bte.shape
    Dv = img.shape[1]
    H = params["w_hh"].shape[1]
    C = params["b_cls"].shape[0]
    assert T >= 1, "empty sequence not supported"

    LANE, SUB = 128, 8
    Hp = _round_up(H, LANE)
    Dvp = _round_up(Dv, LANE)
    Cp = _round_up(C, LANE)
    Bp = _round_up(B, SUB)
    f32 = jnp.float32
    # TODO(synk): on v6e/v7x, cast weights/x to bfloat16 (keep f32 accumulation
    # and f32 h/c scratch) to halve DMA bytes; kept f32 here for v5e numerics.

    def pad_gate_rows(w):  # (4H, ...) -> (4Hp, ...), zero-padding each gate block
        tail = w.shape[1:]
        w4 = w.reshape(4, H, *tail)
        pad = [(0, 0), (0, Hp - H)] + [(0, 0)] * len(tail)
        return jnp.pad(w4, pad).reshape(4 * Hp, *tail)

    wih_t = pad_gate_rows(params["w_ih"]).T.astype(f32)              # (E, 4Hp)
    whh = pad_gate_rows(params["w_hh"])                              # (4Hp, H)
    whh_t = jnp.pad(whh, ((0, 0), (0, Hp - H))).T.astype(f32)        # (Hp, 4Hp)
    b = pad_gate_rows((params["b_ih"] + params["b_hh"])[:, None])    # (4Hp, 1)
    b = b.reshape(1, 4 * Hp).astype(f32)

    wt = jnp.pad(params["w_cls"][:, :H], ((0, 0), (0, Hp - H)))      # (C, Hp)
    wv = jnp.pad(params["w_cls"][:, H:], ((0, 0), (0, Dvp - Dv)))    # (C, Dvp)
    wcls = jnp.concatenate([wt, wv], axis=1)                         # (C, Hp+Dvp)
    wcls_t = jnp.pad(wcls, ((0, Cp - C), (0, 0))).T.astype(f32)      # (Hp+Dvp, Cp)
    bcls = jnp.pad(params["b_cls"], (0, Cp - C)).reshape(1, Cp).astype(f32)

    # Time-major, batch padded to a sublane multiple, flattened to (T*Bp, E).
    x_tbe = jnp.transpose(x_bte, (1, 0, 2)).astype(f32)
    x_tbe = jnp.pad(x_tbe, ((0, 0), (0, Bp - B), (0, 0)))
    x_flat = x_tbe.reshape(T * Bp, E)
    img_p = jnp.pad(img.astype(f32), ((0, Bp - B), (0, Dvp - Dv)))   # (Bp, Dvp)

    t_chunk = _pick_chunk(T)
    num_chunks = T // t_chunk

    kernel = functools.partial(
        lstm_classifier_kernel, batch=Bp, chunk_steps=t_chunk
    )

    grid_spec = pltpu.PrefetchScalarGridSpec(
        num_scalar_prefetch=0,
        grid=(num_chunks,),
        in_specs=[
            pl.BlockSpec((t_chunk * Bp, E), lambda c: (c, 0)),
            pl.BlockSpec((Bp, Dvp), lambda c: (0, 0)),
            pl.BlockSpec((E, 4 * Hp), lambda c: (0, 0)),
            pl.BlockSpec((Hp, 4 * Hp), lambda c: (0, 0)),
            pl.BlockSpec((1, 4 * Hp), lambda c: (0, 0)),
            pl.BlockSpec((Hp + Dvp, Cp), lambda c: (0, 0)),
            pl.BlockSpec((1, Cp), lambda c: (0, 0)),
        ],
        out_specs=pl.BlockSpec((Bp, Cp), lambda c: (0, 0)),
        scratch_shapes=[
            pltpu.VMEM((Bp, Hp), jnp.float32),
            pltpu.VMEM((Bp, Hp), jnp.float32),
            pltpu.VMEM((t_chunk * Bp, 4 * Hp), jnp.float32),
        ],
    )

    out = pl.pallas_call(
        kernel,
        out_shape=jax.ShapeDtypeStruct((Bp, Cp), jnp.float32),
        grid_spec=grid_spec,
        compiler_params=pltpu.CompilerParams(
            # Time chunks are a serial recurrence -> "arbitrary".
            # TODO(synk): for large batches on v7x, add a leading "parallel"
            # batch-tile grid axis to use both TensorCores.
            dimension_semantics=("arbitrary",),
            vmem_limit_bytes=32 * 1024 * 1024,
        ),
    )(x_flat, img_p, wih_t, whh_t, b, wcls_t, bcls)

    return out[:B, :C]


def reference_forward(x_bte, img, params):
    """Pure-JAX reference of the same forward (for correctness check)."""
    B, T, E = x_bte.shape
    H = params["w_hh"].shape[1]
    w_ih_t = params["w_ih"].T
    w_hh_t = params["w_hh"].T
    b = params["b_ih"] + params["b_hh"]

    def step(carry, x_t):
        h, c = carry
        gates = x_t @ w_ih_t + h @ w_hh_t + b
        i_g = jax.nn.sigmoid(gates[:, 0 * H:1 * H])
        f_g = jax.nn.sigmoid(gates[:, 1 * H:2 * H])
        g_g = jnp.tanh(gates[:, 2 * H:3 * H])
        o_g = jax.nn.sigmoid(gates[:, 3 * H:4 * H])
        c = f_g * c + i_g * g_g
        h = o_g * jnp.tanh(c)
        return (h, c), None

    x_tbe = jnp.transpose(x_bte, (1, 0, 2))
    h0 = jnp.zeros((B, H), jnp.float32)
    c0 = jnp.zeros((B, H), jnp.float32)
    (h, _), _ = lax.scan(step, (h0, c0), x_tbe)
    feats = jnp.concatenate([h, img], axis=1)
    return feats @ params["w_cls"].T + params["b_cls"]


if __name__ == "__main__":
    # Small, module-consistent shapes: B=2 pairs, T=8 tokens, E=32 token-emb
    # dim, H=32 LSTM hidden, Dv=64 image emb, C=2 classes.
    B, T, E, H, Dv, C = 2, 8, 32, 32, 64, 2

    key = jax.random.PRNGKey(0)
    ks = jax.random.split(key, 8)

    # Deterministic synthetic parameters in PyTorch layouts.
    params = {
        "w_ih": jax.random.normal(ks[0], (4 * H, E), jnp.float32) * 0.1,
        "w_hh": jax.random.normal(ks[1], (4 * H, H), jnp.float32) * 0.1,
        "b_ih": jax.random.normal(ks[2], (4 * H,), jnp.float32) * 0.1,
        "b_hh": jax.random.normal(ks[3], (4 * H,), jnp.float32) * 0.1,
        "w_cls": jax.random.normal(ks[4], (C, H + Dv), jnp.float32) * 0.1,
        "b_cls": jax.random.normal(ks[5], (C,), jnp.float32) * 0.1,
    }

    # Inputs: token embeddings [B, T, E] (batch_first, as in the module) and
    # cached image-encoder features [B, Dv].
    x_bte = jax.random.normal(ks[6], (B, T, E), jnp.float32)
    img = jax.random.normal(ks[7], (B, Dv), jnp.float32)

    logits = my_lstm_model_forward(x_bte, img, params)
    logits = jax.block_until_ready(logits)

    ref = reference_forward(x_bte, img, params)
    assert logits.shape == (B, C)
    assert jnp.allclose(logits, ref, atol=1e-4, rtol=1e-4), (logits, ref)

    print("KERNEL_OK")
</pallas_src>

<mosaic_0001>
module attributes {stable_mosaic.version = 11 : i64} {
  func.func @lstm_classifier_kernel(%arg0: i32, %arg1: memref<64x32xf32, #tpu.memory_space<vmem>>, %arg2: memref<8x128xf32, #tpu.memory_space<vmem>>, %arg3: memref<32x512xf32, #tpu.memory_space<vmem>>, %arg4: memref<128x512xf32, #tpu.memory_space<vmem>>, %arg5: memref<1x512xf32, #tpu.memory_space<vmem>>, %arg6: memref<256x128xf32, #tpu.memory_space<vmem>>, %arg7: memref<1x128xf32, #tpu.memory_space<vmem>>, %arg8: memref<8x128xf32, #tpu.memory_space<vmem>>, %arg9: memref<8x128xf32, #tpu.memory_space<vmem>>, %arg10: memref<8x128xf32, #tpu.memory_space<vmem>>, %arg11: memref<64x512xf32, #tpu.memory_space<vmem>>) attributes {dimension_semantics = [#tpu.dimension_semantics<arbitrary>], iteration_bounds = array<i64: 1>, scalar_prefetch = 0 : i64, scratch_operands = 3 : i64, tpu.core_type = #tpu.core_type<tc>, window_params = [{transform_indices = @transform_0, window_bounds = array<i64: 64, 32>}, {pipeline_mode = #tpu.pipeline_mode<synchronous>, transform_indices = @transform_1, window_bounds = array<i64: 8, 128>}, {pipeline_mode = #tpu.pipeline_mode<synchronous>, transform_indices = @transform_2, window_bounds = array<i64: 32, 512>}, {pipeline_mode = #tpu.pipeline_mode<synchronous>, transform_indices = @transform_3, window_bounds = array<i64: 128, 512>}, {pipeline_mode = #tpu.pipeline_mode<synchronous>, transform_indices = @transform_4, window_bounds = array<i64: 1, 512>}, {pipeline_mode = #tpu.pipeline_mode<synchronous>, transform_indices = @transform_5, window_bounds = array<i64: 256, 128>}, {pipeline_mode = #tpu.pipeline_mode<synchronous>, transform_indices = @transform_6, window_bounds = array<i64: 1, 128>}, {pipeline_mode = #tpu.pipeline_mode<synchronous>, transform_indices = @transform_7, window_bounds = array<i64: 8, 128>}]} {
    %c0_i32 = arith.constant 0 : i32
    %0 = arith.cmpi eq, %arg0, %c0_i32 : i32
    %1 = arith.extui %0 : i1 to i32
    %c0_i32_0 = arith.constant 0 : i32
    %2 = arith.cmpi ne, %1, %c0_i32_0 : i32
    scf.if %2 {
      %cst_69 = arith.constant 0.000000e+00 : f32
      %266 = vector.broadcast %cst_69 : f32 to vector<8x128xf32>
      %c0_70 = arith.constant 0 : index
      %c0_71 = arith.constant 0 : index
      %267 = vector.load %arg9[%c0_70, %c0_71] : memref<8x128xf32, #tpu.memory_space<vmem>>, vector<8x128xf32>
      tpu.vector_store %arg9[%c0_70, %c0_71], %266 {strides = array<i32>} : memref<8x128xf32, #tpu.memory_space<vmem>>, vector<8x128xf32>,
      %cst_72 = arith.constant 0.000000e+00 : f32
      %268 = vector.broadcast %cst_72 : f32 to vector<8x128xf32>
      %c0_73 = arith.constant 0 : index
      %c0_74 = arith.constant 0 : index
      %269 = vector.load %arg10[%c0_73, %c0_74] : memref<8x128xf32, #tpu.memory_space<vmem>>, vector<8x128xf32>
      tpu.vector_store %arg10[%c0_73, %c0_74], %268 {strides = array<i32>} : memref<8x128xf32, #tpu.memory_space<vmem>>, vector<8x128xf32>,
    } else {
    }
    %c0 = arith.constant 0 : index
    %c0_1 = arith.constant 0 : index
    %3 = vector.load %arg1[%c0, %c0_1] : memref<64x32xf32, #tpu.memory_space<vmem>>, vector<64x32xf32>
    %c0_2 = arith.constant 0 : index
    %c0_3 = arith.constant 0 : index
    %4 = vector.load %arg3[%c0_2, %c0_3] : memref<32x512xf32, #tpu.memory_space<vmem>>, vector<32x512xf32>
    %cst = arith.constant dense<0.000000e+00> : vector<64x512xf32>
    %5 = tpu.matmul %3, %4, %cst {dimension_numbers = #tpu.dot_dimension_numbers<[1], [0], [0], [1], [0, 0, 1, 1], [], []>} : vector<64x32xf32>, vector<32x512xf32>, vector<64x512xf32> -> vector<64x512xf32>
    %c0_4 = arith.constant 0 : index
    %c0_5 = arith.constant 0 : index
    %6 = vector.load %arg5[%c0_4, %c0_5] : memref<1x512xf32, #tpu.memory_space<vmem>>, vector<1x512xf32>
    %7 = vector.broadcast %6 : vector<1x512xf32> to vector<64x512xf32>
    %8 = arith.addf %5, %7 : vector<64x512xf32>
    %c0_6 = arith.constant 0 : index
    %c0_7 = arith.constant 0 : index
    %9 = vector.load %arg11[%c0_6, %c0_7] : memref<64x512xf32, #tpu.memory_space<vmem>>, vector<64x512xf32>
    tpu.vector_store %arg11[%c0_6, %c0_7], %8 {strides = array<i32>} : memref<64x512xf32, #tpu.memory_space<vmem>>, vector<64x512xf32>,
    %c0_8 = arith.constant 0 : index
    %c0_9 = arith.constant 0 : index
    %10 = vector.load %arg4[%c0_8, %c0_9] : memref<128x512xf32, #tpu.memory_space<vmem>>, vector<128x512xf32>
    %c0_10 = arith.constant 0 : index
    %c0_11 = arith.constant 0 : index
    %11 = vector.load %arg9[%c0_10, %c0_11] : memref<8x128xf32, #tpu.memory_space<vmem>>, vector<8x128xf32>
    %c0_12 = arith.constant 0 : index
    %c0_13 = arith.constant 0 : index
    %12 = vector.load %arg10[%c0_12, %c0_13] : memref<8x128xf32, #tpu.memory_space<vmem>>, vector<8x128xf32>
    %c0_i32_14 = arith.constant 0 : i32
    %c8_i32 = arith.constant 8 : i32
    %13 = arith.muli %c0_i32_14, %c8_i32 : i32
    %14 = tpu.assume_multiple %13, 8 : i32
    %15 = arith.index_cast %14 : i32 to index
    %c0_15 = arith.constant 0 : index
    %16 = vector.load %arg11[%15, %c0_15] : memref<64x512xf32, #tpu.memory_space<vmem>>, vector<8x512xf32>
    %cst_16 = arith.constant dense<0.000000e+00> : vector<8x512xf32>
    %17 = tpu.matmul %11, %10, %cst_16 {dimension_numbers = #tpu.dot_dimension_numbers<[1], [0], [0], [1], [0, 0, 1, 1], [], []>} : vector<8x128xf32>, vector<128x512xf32>, vector<8x512xf32> -> vector<8x512xf32>
    %18 = arith.addf %16, %17 : vector<8x512xf32>
    %19 = vector.extract_strided_slice %18 {offsets = [0, 0], sizes = [8, 128], strides = [1, 1]} : vector<8x512xf32> to vector<8x128xf32>
    %20 = arith.negf %19 : vector<8x128xf32>
    %21 = math.exp %20 : vector<8x128xf32>
    %cst_17 = arith.constant 1.000000e+00 : f32
    %22 = vector.broadcast %cst_17 : f32 to vector<8x128xf32>
    %23 = arith.addf %22, %21 : vector<8x128xf32>
    %24 = arith.divf %22, %23 : vector<8x128xf32>
    %25 = vector.extract_strided_slice %18 {offsets = [0, 128], sizes = [8, 128], strides = [1, 1]} : vector<8x512xf32> to vector<8x128xf32>
    %26 = arith.negf %25 : vector<8x128xf32>
    %27 = math.exp %26 : vector<8x128xf32>
    %cst_18 = arith.constant 1.000000e+00 : f32
    %28 = vector.broadcast %cst_18 : f32 to vector<8x128xf32>
    %29 = arith.addf %28, %27 : vector<8x128xf32>
    %30 = arith.divf %28, %29 : vector<8x128xf32>
    %31 = vector.extract_strided_slice %18 {offsets = [0, 256], sizes = [8, 128], strides = [1, 1]} : vector<8x512xf32> to vector<8x128xf32>
    %32 = math.tanh %31 : vector<8x128xf32>
    %33 = vector.extract_strided_slice %18 {offsets = [0, 384], sizes = [8, 128], strides = [1, 1]} : vector<8x512xf32> to vector<8x128xf32>
    %34 = arith.negf %33 : vector<8x128xf32>
    %35 = math.exp %34 : vector<8x128xf32>
    %cst_19 = arith.constant 1.000000e+00 : f32
    %36 = vector.broadcast %cst_19 : f32 to vector<8x128xf32>
    %37 = arith.addf %36, %35 : vector<8x128xf32>
    %38 = arith.divf %36, %37 : vector<8x128xf32>
    %39 = arith.mulf %30, %12 : vector<8x128xf32>
    %40 = arith.mulf %24, %32 : vector<8x128xf32>
    %41 = arith.addf %39, %40 : vector<8x128xf32>
    %42 = math.tanh %41 : vector<8x128xf32>
    %43 = arith.mulf %38, %42 : vector<8x128xf32>
    %c1_i32 = arith.constant 1 : i32
    %c8_i32_20 = arith.constant 8 : i32
    %44 = arith.muli %c1_i32, %c8_i32_20 : i32
    %45 = tpu.assume_multiple %44, 8 : i32
    %46 = arith.index_cast %45 : i32 to index
    %c0_21 = arith.constant 0 : index
    %47 = vector.load %arg11[%46, %c0_21] : memref<64x512xf32, #tpu.memory_space<vmem>>, vector<8x512xf32>
    %cst_22 = arith.constant dense<0.000000e+00> : vector<8x512xf32>
    %48 = tpu.matmul %43, %10, %cst_22 {dimension_numbers = #tpu.dot_dimension_numbers<[1], [0], [0], [1], [0, 0, 1, 1], [], []>} : vector<8x128xf32>, vector<128x512xf32>, vector<8x512xf32> -> vector<8x512xf32>
    %49 = arith.addf %47, %48 : vector<8x512xf32>
    %50 = vector.extract_strided_slice %49 {offsets = [0, 0], sizes = [8, 128], strides = [1, 1]} : vector<8x512xf32> to vector<8x128xf32>
    %51 = arith.negf %50 : vector<8x128xf32>
    %52 = math.exp %51 : vector<8x128xf32>
    %cst_23 = arith.constant 1.000000e+00 : f32
    %53 = vector.broadcast %cst_23 : f32 to vector<8x128xf32>
    %54 = arith.addf %53, %52 : vector<8x128xf32>
    %55 = arith.divf %53, %54 : vector<8x128xf32>
    %56 = vector.extract_strided_slice %49 {offsets = [0, 128], sizes = [8, 128], strides = [1, 1]} : vector<8x512xf32> to vector<8x128xf32>
    %57 = arith.negf %56 : vector<8x128xf32>
    %58 = math.exp %57 : vector<8x128xf32>
    %cst_24 = arith.constant 1.000000e+00 : f32
    %59 = vector.broadcast %cst_24 : f32 to vector<8x128xf32>
    %60 = arith.addf %59, %58 : vector<8x128xf32>
    %61 = arith.divf %59, %60 : vector<8x128xf32>
    %62 = vector.extract_strided_slice %49 {offsets = [0, 256], sizes = [8, 128], strides = [1, 1]} : vector<8x512xf32> to vector<8x128xf32>
    %63 = math.tanh %62 : vector<8x128xf32>
    %64 = vector.extract_strided_slice %49 {offsets = [0, 384], sizes = [8, 128], strides = [1, 1]} : vector<8x512xf32> to vector<8x128xf32>
    %65 = arith.negf %64 : vector<8x128xf32>
    %66 = math.exp %65 : vector<8x128xf32>
    %cst_25 = arith.constant 1.000000e+00 : f32
    %67 = vector.broadcast %cst_25 : f32 to vector<8x128xf32>
    %68 = arith.addf %67, %66 : vector<8x128xf32>
    %69 = arith.divf %67, %68 : vector<8x128xf32>
    %70 = arith.mulf %61, %41 : vector<8x128xf32>
    %71 = arith.mulf %55, %63 : vector<8x128xf32>
    %72 = arith.addf %70, %71 : vector<8x128xf32>
    %73 = math.tanh %72 : vector<8x128xf32>
    %74 = arith.mulf %69, %73 : vector<8x128xf32>
    %c2_i32 = arith.constant 2 : i32
    %c8_i32_26 = arith.constant 8 : i32
    %75 = arith.muli %c2_i32, %c8_i32_26 : i32
    %76 = tpu.assume_multiple %75, 8 : i32
    %77 = arith.index_cast %76 : i32 to index
    %c0_27 = arith.constant 0 : index
    %78 = vector.load %arg11[%77, %c0_27] : memref<64x512xf32, #tpu.memory_space<vmem>>, vector<8x512xf32>
    %cst_28 = arith.constant dense<0.000000e+00> : vector<8x512xf32>
    %79 = tpu.matmul %74, %10, %cst_28 {dimension_numbers = #tpu.dot_dimension_numbers<[1], [0], [0], [1], [0, 0, 1, 1], [], []>} : vector<8x128xf32>, vector<128x512xf32>, vector<8x512xf32> -> vector<8x512xf32>
    %80 = arith.addf %78, %79 : vector<8x512xf32>
    %81 = vector.extract_strided_slice %80 {offsets = [0, 0], sizes = [8, 128], strides = [1, 1]} : vector<8x512xf32> to vector<8x128xf32>
    %82 = arith.negf %81 : vector<8x128xf32>
    %83 = math.exp %82 : vector<8x128xf32>
    %cst_29 = arith.constant 1.000000e+00 : f32
    %84 = vector.broadcast %cst_29 : f32 to vector<8x128xf32>
    %85 = arith.addf %84, %83 : vector<8x128xf32>
    %86 = arith.divf %84, %85 : vector<8x128xf32>
    %87 = vector.extract_strided_slice %80 {offsets = [0, 128], sizes = [8, 128], strides = [1, 1]} : vector<8x512xf32> to vector<8x128xf32>
    %88 = arith.negf %87 : vector<8x128xf32>
    %89 = math.exp %88 : vector<8x128xf32>
    %cst_30 = arith.constant 1.000000e+00 : f32
    %90 = vector.broadcast %cst_30 : f32 to vector<8x128xf32>
    %91 = arith.addf %90, %89 : vector<8x128xf32>
    %92 = arith.divf %90, %91 : vector<8x128xf32>
    %93 = vector.extract_strided_slice %80 {offsets = [0, 256], sizes = [8, 128], strides = [1, 1]} : vector<8x512xf32> to vector<8x128xf32>
    %94 = math.tanh %93 : vector<8x128xf32>
    %95 = vector.extract_strided_slice %80 {offsets = [0, 384], sizes = [8, 128], strides = [1, 1]} : vector<8x512xf32> to vector<8x128xf32>
    %96 = arith.negf %95 : vector<8x128xf32>
    %97 = math.exp %96 : vector<8x128xf32>
    %cst_31 = arith.constant 1.000000e+00 : f32
    %98 = vector.broadcast %cst_31 : f32 to vector<8x128xf32>
    %99 = arith.addf %98, %97 : vector<8x128xf32>
    %100 = arith.divf %98, %99 : vector<8x128xf32>
    %101 = arith.mulf %92, %72 : vector<8x128xf32>
    %102 = arith.mulf %86, %94 : vector<8x128xf32>
    %103 = arith.addf %101, %102 : vector<8x128xf32>
    %104 = math.tanh %103 : vector<8x128xf32>
    %105 = arith.mulf %100, %104 : vector<8x128xf32>
    %c3_i32 = arith.constant 3 : i32
    %c8_i32_32 = arith.constant 8 : i32
    %106 = arith.muli %c3_i32, %c8_i32_32 : i32
    %107 = tpu.assume_multiple %106, 8 : i32
    %108 = arith.index_cast %107 : i32 to index
    %c0_33 = arith.constant 0 : index
    %109 = vector.load %arg11[%108, %c0_33] : memref<64x512xf32, #tpu.memory_space<vmem>>, vector<8x512xf32>
    %cst_34 = arith.constant dense<0.000000e+00> : vector<8x512xf32>
    %110 = tpu.matmul %105, %10, %cst_34 {dimension_numbers = #tpu.dot_dimension_numbers<[1], [0], [0], [1], [0, 0, 1, 1], [], []>} : vector<8x128xf32>, vector<128x512xf32>, vector<8x512xf32> -> vector<8x512xf32>
    %111 = arith.addf %109, %110 : vector<8x512xf32>
    %112 = vector.extract_strided_slice %111 {offsets = [0, 0], sizes = [8, 128], strides = [1, 1]} : vector<8x512xf32> to vector<8x128xf32>
    %113 = arith.negf %112 : vector<8x128xf32>
    %114 = math.exp %113 : vector<8x128xf32>
    %cst_35 = arith.constant 1.000000e+00 : f32
    %115 = vector.broadcast %cst_35 : f32 to vector<8x128xf32>
    %116 = arith.addf %115, %114 : vector<8x128xf32>
    %117 = arith.divf %115, %116 : vector<8x128xf32>
    %118 = vector.extract_strided_slice %111 {offsets = [0, 128], sizes = [8, 128], strides = [1, 1]} : vector<8x512xf32> to vector<8x128xf32>
    %119 = arith.negf %118 : vector<8x128xf32>
    %120 = math.exp %119 : vector<8x128xf32>
    %cst_36 = arith.constant 1.000000e+00 : f32
    %121 = vector.broadcast %cst_36 : f32 to vector<8x128xf32>
    %122 = arith.addf %121, %120 : vector<8x128xf32>
    %123 = arith.divf %121, %122 : vector<8x128xf32>
    %124 = vector.extract_strided_slice %111 {offsets = [0, 256], sizes = [8, 128], strides = [1, 1]} : vector<8x512xf32> to vector<8x128xf32>
    %125 = math.tanh %124 : vector<8x128xf32>
    %126 = vector.extract_strided_slice %111 {offsets = [0, 384], sizes = [8, 128], strides = [1, 1]} : vector<8x512xf32> to vector<8x128xf32>
    %127 = arith.negf %126 : vector<8x128xf32>
    %128 = math.exp %127 : vector<8x128xf32>
    %cst_37 = arith.constant 1.000000e+00 : f32
    %129 = vector.broadcast %cst_37 : f32 to vector<8x128xf32>
    %130 = arith.addf %129, %128 : vector<8x128xf32>
    %131 = arith.divf %129, %130 : vector<8x128xf32>
    %132 = arith.mulf %123, %103 : vector<8x128xf32>
    %133 = arith.mulf %117, %125 : vector<8x128xf32>
    %134 = arith.addf %132, %133 : vector<8x128xf32>
    %135 = math.tanh %134 : vector<8x128xf32>
    %136 = arith.mulf %131, %135 : vector<8x128xf32>
    %c4_i32 = arith.constant 4 : i32
    %c8_i32_38 = arith.constant 8 : i32
    %137 = arith.muli %c4_i32, %c8_i32_38 : i32
    %138 = tpu.assume_multiple %137, 8 : i32
    %139 = arith.index_cast %138 : i32 to index
    %c0_39 = arith.constant 0 : index
    %140 = vector.load %arg11[%139, %c0_39] : memref<64x512xf32, #tpu.memory_space<vmem>>, vector<8x512xf32>
    %cst_40 = arith.constant dense<0.000000e+00> : vector<8x512xf32>
    %141 = tpu.matmul %136, %10, %cst_40 {dimension_numbers = #tpu.dot_dimension_numbers<[1], [0], [0], [1], [0, 0, 1, 1], [], []>} : vector<8x128xf32>, vector<128x512xf32>, vector<8x512xf32> -> vector<8x512xf32>
    %142 = arith.addf %140, %141 : vector<8x512xf32>
    %143 = vector.extract_strided_slice %142 {offsets = [0, 0], sizes = [8, 128], strides = [1, 1]} : vector<8x512xf32> to vector<8x128xf32>
    %144 = arith.negf %143 : vector<8x128xf32>
    %145 = math.exp %144 : vector<8x128xf32>
    %cst_41 = arith.constant 1.000000e+00 : f32
    %146 = vector.broadcast %cst_41 : f32 to vector<8x128xf32>
    %147 = arith.addf %146, %145 : vector<8x128xf32>
    %148 = arith.divf %146, %147 : vector<8x128xf32>
    %149 = vector.extract_strided_slice %142 {offsets = [0, 128], sizes = [8, 128], strides = [1, 1]} : vector<8x512xf32> to vector<8x128xf32>
    %150 = arith.negf %149 : vector<8x128xf32>
    %151 = math.exp %150 : vector<8x128xf32>
    %cst_42 = arith.constant 1.000000e+00 : f32
    %152 = vector.broadcast %cst_42 : f32 to vector<8x128xf32>
    %153 = arith.addf %152, %151 : vector<8x128xf32>
    %154 = arith.divf %152, %153 : vector<8x128xf32>
    %155 = vector.extract_strided_slice %142 {offsets = [0, 256], sizes = [8, 128], strides = [1, 1]} : vector<8x512xf32> to vector<8x128xf32>
    %156 = math.tanh %155 : vector<8x128xf32>
    %157 = vector.extract_strided_slice %142 {offsets = [0, 384], sizes = [8, 128], strides = [1, 1]} : vector<8x512xf32> to vector<8x128xf32>
    %158 = arith.negf %157 : vector<8x128xf32>
    %159 = math.exp %158 : vector<8x128xf32>
    %cst_43 = arith.constant 1.000000e+00 : f32
    %160 = vector.broadcast %cst_43 : f32 to vector<8x128xf32>
    %161 = arith.addf %160, %159 : vector<8x128xf32>
    %162 = arith.divf %160, %161 : vector<8x128xf32>
    %163 = arith.mulf %154, %134 : vector<8x128xf32>
    %164 = arith.mulf %148, %156 : vector<8x128xf32>
    %165 = arith.addf %163, %164 : vector<8x128xf32>
    %166 = math.tanh %165 : vector<8x128xf32>
    %167 = arith.mulf %162, %166 : vector<8x128xf32>
    %c5_i32 = arith.constant 5 : i32
    %c8_i32_44 = arith.constant 8 : i32
    %168 = arith.muli %c5_i32, %c8_i32_44 : i32
    %169 = tpu.assume_multiple %168, 8 : i32
    %170 = arith.index_cast %169 : i32 to index
    %c0_45 = arith.constant 0 : index
    %171 = vector.load %arg11[%170, %c0_45] : memref<64x512xf32, #tpu.memory_space<vmem>>, vector<8x512xf32>
    %cst_46 = arith.constant dense<0.000000e+00> : vector<8x512xf32>
    %172 = tpu.matmul %167, %10, %cst_46 {dimension_numbers = #tpu.dot_dimension_numbers<[1], [0], [0], [1], [0, 0, 1, 1], [], []>} : vector<8x128xf32>, vector<128x512xf32>, vector<8x512xf32> -> vector<8x512xf32>
    %173 = arith.addf %171, %172 : vector<8x512xf32>
    %174 = vector.extract_strided_slice %173 {offsets = [0, 0], sizes = [8, 128], strides = [1, 1]} : vector<8x512xf32> to vector<8x128xf32>
    %175 = arith.negf %174 : vector<8x128xf32>
    %176 = math.exp %175 : vector<8x128xf32>
    %cst_47 = arith.constant 1.000000e+00 : f32
    %177 = vector.broadcast %cst_47 : f32 to vector<8x128xf32>
    %178 = arith.addf %177, %176 : vector<8x128xf32>
    %179 = arith.divf %177, %178 : vector<8x128xf32>
    %180 = vector.extract_strided_slice %173 {offsets = [0, 128], sizes = [8, 128], strides = [1, 1]} : vector<8x512xf32> to vector<8x128xf32>
    %181 = arith.negf %180 : vector<8x128xf32>
    %182 = math.exp %181 : vector<8x128xf32>
    %cst_48 = arith.constant 1.000000e+00 : f32
    %183 = vector.broadcast %cst_48 : f32 to vector<8x128xf32>
    %184 = arith.addf %183, %182 : vector<8x128xf32>
    %185 = arith.divf %183, %184 : vector<8x128xf32>
    %186 = vector.extract_strided_slice %173 {offsets = [0, 256], sizes = [8, 128], strides = [1, 1]} : vector<8x512xf32> to vector<8x128xf32>
    %187 = math.tanh %186 : vector<8x128xf32>
    %188 = vector.extract_strided_slice %173 {offsets = [0, 384], sizes = [8, 128], strides = [1, 1]} : vector<8x512xf32> to vector<8x128xf32>
    %189 = arith.negf %188 : vector<8x128xf32>
    %190 = math.exp %189 : vector<8x128xf32>
    %cst_49 = arith.constant 1.000000e+00 : f32
    %191 = vector.broadcast %cst_49 : f32 to vector<8x128xf32>
    %192 = arith.addf %191, %190 : vector<8x128xf32>
    %193 = arith.divf %191, %192 : vector<8x128xf32>
    %194 = arith.mulf %185, %165 : vector<8x128xf32>
    %195 = arith.mulf %179, %187 : vector<8x128xf32>
    %196 = arith.addf %194, %195 : vector<8x128xf32>
    %197 = math.tanh %196 : vector<8x128xf32>
    %198 = arith.mulf %193, %197 : vector<8x128xf32>
    %c6_i32 = arith.constant 6 : i32
    %c8_i32_50 = arith.constant 8 : i32
    %199 = arith.muli %c6_i32, %c8_i32_50 : i32
    %200 = tpu.assume_multiple %199, 8 : i32
    %201 = arith.index_cast %200 : i32 to index
    %c0_51 = arith.constant 0 : index
    %202 = vector.load %arg11[%201, %c0_51] : memref<64x512xf32, #tpu.memory_space<vmem>>, vector<8x512xf32>
    %cst_52 = arith.constant dense<0.000000e+00> : vector<8x512xf32>
    %203 = tpu.matmul %198, %10, %cst_52 {dimension_numbers = #tpu.dot_dimension_numbers<[1], [0], [0], [1], [0, 0, 1, 1], [], []>} : vector<8x128xf32>, vector<128x512xf32>, vector<8x512xf32> -> vector<8x512xf32>
    %204 = arith.addf %202, %203 : vector<8x512xf32>
    %205 = vector.extract_strided_slice %204 {offsets = [0, 0], sizes = [8, 128], strides = [1, 1]} : vector<8x512xf32> to vector<8x128xf32>
    %206 = arith.negf %205 : vector<8x128xf32>
    %207 = math.exp %206 : vector<8x128xf32>
    %cst_53 = arith.constant 1.000000e+00 : f32
    %208 = vector.broadcast %cst_53 : f32 to vector<8x128xf32>
    %209 = arith.addf %208, %207 : vector<8x128xf32>
    %210 = arith.divf %208, %209 : vector<8x128xf32>
    %211 = vector.extract_strided_slice %204 {offsets = [0, 128], sizes = [8, 128], strides = [1, 1]} : vector<8x512xf32> to vector<8x128xf32>
    %212 = arith.negf %211 : vector<8x128xf32>
    %213 = math.exp %212 : vector<8x128xf32>
    %cst_54 = arith.constant 1.000000e+00 : f32
    %214 = vector.broadcast %cst_54 : f32 to vector<8x128xf32>
    %215 = arith.addf %214, %213 : vector<8x128xf32>
    %216 = arith.divf %214, %215 : vector<8x128xf32>
    %217 = vector.extract_strided_slice %204 {offsets = [0, 256], sizes = [8, 128], strides = [1, 1]} : vector<8x512xf32> to vector<8x128xf32>
    %218 = math.tanh %217 : vector<8x128xf32>
    %219 = vector.extract_strided_slice %204 {offsets = [0, 384], sizes = [8, 128], strides = [1, 1]} : vector<8x512xf32> to vector<8x128xf32>
    %220 = arith.negf %219 : vector<8x128xf32>
    %221 = math.exp %220 : vector<8x128xf32>
    %cst_55 = arith.constant 1.000000e+00 : f32
    %222 = vector.broadcast %cst_55 : f32 to vector<8x128xf32>
    %223 = arith.addf %222, %221 : vector<8x128xf32>
    %224 = arith.divf %222, %223 : vector<8x128xf32>
    %225 = arith.mulf %216, %196 : vector<8x128xf32>
    %226 = arith.mulf %210, %218 : vector<8x128xf32>
    %227 = arith.addf %225, %226 : vector<8x128xf32>
    %228 = math.tanh %227 : vector<8x128xf32>
    %229 = arith.mulf %224, %228 : vector<8x128xf32>
    %c7_i32 = arith.constant 7 : i32
    %c8_i32_56 = arith.constant 8 : i32
    %230 = arith.muli %c7_i32, %c8_i32_56 : i32
    %231 = tpu.assume_multiple %230, 8 : i32
    %232 = arith.index_cast %231 : i32 to index
    %c0_57 = arith.constant 0 : index
    %233 = vector.load %arg11[%232, %c0_57] : memref<64x512xf32, #tpu.memory_space<vmem>>, vector<8x512xf32>
    %cst_58 = arith.constant dense<0.000000e+00> : vector<8x512xf32>
    %234 = tpu.matmul %229, %10, %cst_58 {dimension_numbers = #tpu.dot_dimension_numbers<[1], [0], [0], [1], [0, 0, 1, 1], [], []>} : vector<8x128xf32>, vector<128x512xf32>, vector<8x512xf32> -> vector<8x512xf32>
    %235 = arith.addf %233, %234 : vector<8x512xf32>
    %236 = vector.extract_strided_slice %235 {offsets = [0, 0], sizes = [8, 128], strides = [1, 1]} : vector<8x512xf32> to vector<8x128xf32>
    %237 = arith.negf %236 : vector<8x128xf32>
    %238 = math.exp %237 : vector<8x128xf32>
    %cst_59 = arith.constant 1.000000e+00 : f32
    %239 = vector.broadcast %cst_59 : f32 to vector<8x128xf32>
    %240 = arith.addf %239, %238 : vector<8x128xf32>
    %241 = arith.divf %239, %240 : vector<8x128xf32>
    %242 = vector.extract_strided_slice %235 {offsets = [0, 128], sizes = [8, 128], strides = [1, 1]} : vector<8x512xf32> to vector<8x128xf32>
    %243 = arith.negf %242 : vector<8x128xf32>
    %244 = math.exp %243 : vector<8x128xf32>
    %cst_60 = arith.constant 1.000000e+00 : f32
    %245 = vector.broadcast %cst_60 : f32 to vector<8x128xf32>
    %246 = arith.addf %245, %244 : vector<8x128xf32>
    %247 = arith.divf %245, %246 : vector<8x128xf32>
    %248 = vector.extract_strided_slice %235 {offsets = [0, 256], sizes = [8, 128], strides = [1, 1]} : vector<8x512xf32> to vector<8x128xf32>
    %249 = math.tanh %248 : vector<8x128xf32>
    %250 = vector.extract_strided_slice %235 {offsets = [0, 384], sizes = [8, 128], strides = [1, 1]} : vector<8x512xf32> to vector<8x128xf32>
    %251 = arith.negf %250 : vector<8x128xf32>
    %252 = math.exp %251 : vector<8x128xf32>
    %cst_61 = arith.constant 1.000000e+00 : f32
    %253 = vector.broadcast %cst_61 : f32 to vector<8x128xf32>
    %254 = arith.addf %253, %252 : vector<8x128xf32>
    %255 = arith.divf %253, %254 : vector<8x128xf32>
    %256 = arith.mulf %247, %227 : vector<8x128xf32>
    %257 = arith.mulf %241, %249 : vector<8x128xf32>
    %258 = arith.addf %256, %257 : vector<8x128xf32>
    %259 = math.tanh %258 : vector<8x128xf32>
    %260 = arith.mulf %255, %259 : vector<8x128xf32>
    %c8_i32_62 = arith.constant 8 : i32
    %c0_63 = arith.constant 0 : index
    %c0_64 = arith.constant 0 : index
    %261 = vector.load %arg9[%c0_63, %c0_64] : memref<8x128xf32, #tpu.memory_space<vmem>>, vector<8x128xf32>
    tpu.vector_store %arg9[%c0_63, %c0_64], %260 {strides = array<i32>} : memref<8x128xf32, #tpu.memory_space<vmem>>, vector<8x128xf32>,
    %c0_65 = arith.constant 0 : index
    %c0_66 = arith.constant 0 : index
    %262 = vector.load %arg10[%c0_65, %c0_66] : memref<8x128xf32, #tpu.memory_space<vmem>>, vector<8x128xf32>
    tpu.vector_store %arg10[%c0_65, %c0_66], %258 {strides = array<i32>} : memref<8x128xf32, #tpu.memory_space<vmem>>, vector<8x128xf32>,
    %c0_i32_67 = arith.constant 0 : i32
    %263 = arith.cmpi eq, %arg0, %c0_i32_67 : i32
    %264 = arith.extui %263 : i1 to i32
    %c0_i32_68 = arith.constant 0 : i32
    %265 = arith.cmpi ne, %264, %c0_i32_68 : i32
    scf.if %265 {
      %c0_69 = arith.constant 0 : index
      %c0_70 = arith.constant 0 : index
      %266 = vector.load %arg2[%c0_69, %c0_70] : memref<8x128xf32, #tpu.memory_space<vmem>>, vector<8x128xf32>
      %267 = tpu.concatenate %260, %266 in 1 : vector<8x128xf32>, vector<8x128xf32> -> vector<8x256xf32>
      %c0_71 = arith.constant 0 : index
      %c0_72 = arith.constant 0 : index
      %268 = vector.load %arg6[%c0_71, %c0_72] : memref<256x128xf32, #tpu.memory_space<vmem>>, vector<256x128xf32>
      %cst_73 = arith.constant dense<0.000000e+00> : vector<8x128xf32>
      %269 = tpu.matmul %267, %268, %cst_73 {dimension_numbers = #tpu.dot_dimension_numbers<[1], [0], [0], [1], [0, 0, 1, 1], [], []>} : vector<8x256xf32>, vector<256x128xf32>, vector<8x128xf32> -> vector<8x128xf32>
      %c0_74 = arith.constant 0 : index
      %c0_75 = arith.constant 0 : index
      %270 = vector.load %arg7[%c0_74, %c0_75] : memref<1x128xf32, #tpu.memory_space<vmem>>, vector<1x128xf32>
      %271 = vector.broadcast %270 : vector<1x128xf32> to vector<8x128xf32>
      %272 = arith.addf %269, %271 : vector<8x128xf32>
      %c0_76 = arith.constant 0 : index
      %c0_77 = arith.constant 0 : index
      %273 = vector.load %arg8[%c0_76, %c0_77] : memref<8x128xf32, #tpu.memory_space<vmem>>, vector<8x128xf32>
      tpu.vector_store %arg8[%c0_76, %c0_77], %272 {strides = array<i32>} : memref<8x128xf32, #tpu.memory_space<vmem>>, vector<8x128xf32>,
    } else {
    }
    return
  }
  func.func @transform_0(%arg0: i32) -> (i32, i32) {
    %c0_i32 = arith.constant 0 : i32
    %c0_i32_0 = arith.constant 0 : i32
    return %arg0, %c0_i32 : i32, i32
  }
  func.func @transform_1(%arg0: i32) -> (i32, i32) {
    %c0_i32 = arith.constant 0 : i32
    %c0_i32_0 = arith.constant 0 : i32
    %c0_i32_1 = arith.constant 0 : i32
    return %c0_i32, %c0_i32_0 : i32, i32
  }
  func.func @transform_2(%arg0: i32) -> (i32, i32) {
    %c0_i32 = arith.constant 0 : i32
    %c0_i32_0 = arith.constant 0 : i32
    %c0_i32_1 = arith.constant 0 : i32
    return %c0_i32, %c0_i32_0 : i32, i32
  }
  func.func @transform_3(%arg0: i32) -> (i32, i32) {
    %c0_i32 = arith.constant 0 : i32
    %c0_i32_0 = arith.constant 0 : i32
    %c0_i32_1 = arith.constant 0 : i32
    return %c0_i32, %c0_i32_0 : i32, i32
  }
  func.func @transform_4(%arg0: i32) -> (i32, i32) {
    %c0_i32 = arith.constant 0 : i32
    %c0_i32_0 = arith.constant 0 : i32
    %c0_i32_1 = arith.constant 0 : i32
    return %c0_i32, %c0_i32_0 : i32, i32
  }
  func.func @transform_5(%arg0: i32) -> (i32, i32) {
    %c0_i32 = arith.constant 0 : i32
    %c0_i32_0 = arith.constant 0 : i32
    %c0_i32_1 = arith.constant 0 : i32
    return %c0_i32, %c0_i32_0 : i32, i32
  }
  func.func @transform_6(%arg0: i32) -> (i32, i32) {
    %c0_i32 = arith.constant 0 : i32
    %c0_i32_0 = arith.constant 0 : i32
    %c0_i32_1 = arith.constant 0 : i32
    return %c0_i32, %c0_i32_0 : i32, i32
  }
  func.func @transform_7(%arg0: i32) -> (i32, i32) {
    %c0_i32 = arith.constant 0 : i32
    %c0_i32_0 = arith.constant 0 : i32
    %c0_i32_1 = arith.constant 0 : i32
    return %c0_i32, %c0_i32_0 : i32, i32
  }
}

</mosaic_0001>

<bundles_post_ra>
// kernel: tpu_custom_call.1
= control target key start
LH: loop header
LB: loop body
LE: loop exit
PB: predicated region body
PF: predicated region fallthrough
CT: control target
= control target key end

     0   :  { %12 = vsyncpa [#allocation6], 0  ;;  %s3443_s0 = inlined_call_operand.vmem [shape: f32[64,32], index: 0, kind: input, shape index: {}]   ;;  %s3444_s1 = inlined_call_operand.vmem [shape: f32[8,128], index: 1, kind: input, shape index: {}]   ;;  %s3445_s2 = inlined_call_operand.hbm [shape: f32[32,512], index: 2, kind: input, shape index: {}]   ;;  %s3446_s3 = inlined_call_operand.hbm [shape: f32[128,512], index: 3, kind: input, shape index: {}]   ;;  %s3447_s4 = inlined_call_operand.vmem [shape: f32[1,512], index: 4, kind: input, shape index: {}]   ;;  %s3448_s5 = inlined_call_operand.hbm [shape: f32[256,128], index: 5, kind: input, shape index: {}]   ;;  %s3449_s6 = inlined_call_operand.vmem [shape: f32[1,128], index: 6, kind: input, shape index: {}]   ;;  %s3450_s7 = inlined_call_operand.hbm [shape: f32[8,128], index: 7, kind: output, shape index: {}]  }
   0x1   :  { %13 = vsyncpa [#allocation9], 0 }
   0x2   :  { %14 = vsyncpa [#allocation7], 0  ;;  %s2387_s24 = smov [#allocation8]   ;;  %s2388_s26 = smov [#allocation5]  }
   0x3   :  { %s36_s25 = sshll.u32 %s2387_s24, 4  ;;  %s24_s27 = sshll.u32 %s2388_s26, 4  ;;  %s37_s25 = int_to_ptr.vmem [resolvable:$true] %s36_s25  ;;  %s25_s27 = int_to_ptr.vmem [resolvable:$true] %s24_s27 }
   0x4   :  { %s2309_s28 = scalar_lea.vmem %s37_s25, 8192  ;;  %p2314_p1 = scmp.lt.s32.totalorder %s37_s25, %s37_s25 }
   0x5   :  { %p2310_p0 = scmp.ne.s32.totalorder %s37_s25, %s2309_s28  ;;  %p2315_p2 = scmp.lt.s32.totalorder %s2309_s28, %s2309_s28 }
   0x7   :  { %p2316_p3 = por %p2315_p2, %p2314_p1 }
   0x9   :  { %p2317_p4 = pnand %p2316_p3, %p2310_p0 }
   0xb   :  { %2320 = shalt.err (!%p2317_p4)
}
   0xc   :  { %s2389_s29 = smov 512   ;;  %s2390_s30 = smov 32  }
   0xd   :  { %42 = dma.hbm_to_vmem [thread:$0]  %s3446_s3, 8192, %s37_s25, [#allocation9], %s2389_s29, %s2389_s29, %s2390_s30  }
   0xe   :  { %s2329_s10 = scalar_lea.vmem %s25_s27, 2048  ;;  %p2334_p6 = scmp.lt.s32.totalorder %s25_s27, %s25_s27 }
   0xf   :  { %p2330_p5 = scmp.ne.s32.totalorder %s25_s27, %s2329_s10  ;;  %p2335_p7 = scmp.lt.s32.totalorder %s2329_s10, %s2329_s10 }
  0x11   :  { %p2336_p8 = por %p2335_p7, %p2334_p6 }
  0x13   :  { %p2337_p9 = pnand %p2336_p8, %p2330_p5 }
  0x15   :  { %2340 = shalt.err (!%p2337_p9)
}
  0x16   :  { %30 = dma.hbm_to_vmem [thread:$0]  %s3445_s2, 2048, %s25_s27, [#allocation6], %s2389_s29, %s2389_s29, %s2390_s30  }
  0x17   :  { %s2391_s13 = smov [#allocation10]  }
  0x18   :  { %s50_s14 = sshll.u32 %s2391_s13, 4  ;;  %s51_s14 = int_to_ptr.vmem [resolvable:$true] %s50_s14 }
  0x19   :  { %s2349_s15 = scalar_lea.vmem %s51_s14, 4096  ;;  %p2354_p11 = scmp.lt.s32.totalorder %s51_s14, %s51_s14 }
  0x1a   :  { %p2350_p10 = scmp.ne.s32.totalorder %s51_s14, %s2349_s15  ;;  %p2355_p12 = scmp.lt.s32.totalorder %s2349_s15, %s2349_s15 }
  0x1c   :  { %p2356_p13 = por %p2355_p12, %p2354_p11 }
  0x1e   :  { %p2357_p0 = pnand %p2356_p13, %p2350_p10 }
  0x20   :  { %2360 = shalt.err (!%p2357_p0)
}
  0x21   :  { %s2392_s3 = smov 128   ;;  %s2393_s16 = smov 8  }
  0x22   :  { %56 = dma.hbm_to_vmem [thread:$0]  %s3448_s5, 4096, %s51_s14, [#allocation9], %s2392_s3, %s2392_s3, %s2393_s16  }
  0x23   :  { %2381 = dma.done.wait [#allocation6], 2048  }
  0x24   :  { %2382 = vsyncadd [#allocation6], 4294965248 }
  0x25   :  { %2383 = dma.done.wait [#allocation9], 12288  }
  0x26   :  { %2384 = vsyncadd [#allocation9], 4294955008  ;;  %v3451_v0 = vmov 0.0   ;;  %v95_v1 = vld [vmem:[#allocation5 + $0x68] sm:$0xff]  ;;  %v97_v2 = vld [vmem:[#allocation5 + $0x78] sm:$0xff]  ;;  %vm120_vm0 = vcmask 261120  }
  0x27   :  { %209 = vmatprep.mubr.f32.mxu0 %v3451_v0  ;;  %322 = vmatprep.mubr.f32.mxu1 %v3451_v0  ;;  %v94_v3 = vld [vmem:[#allocation5 + $0x60] sm:$0xff]  ;;  %v96_v4 = vld [vmem:[#allocation5 + $0x70] sm:$0xff]  ;;  %v91_v5 = vld [vmem:[#allocation5 + $0x48] sm:$0xff]  ;;  %s2395_s13 = smov [#allocation11]  }
  0x28   :  { %169 = vmatprep.subr.mxu0 %v95_v1  ;;  %282 = vmatprep.subr.mxu1 %v97_v2  ;;  %v93_v6 = vld [vmem:[#allocation5 + $0x58] sm:$0xff]  ;;  %v90_v7 = vld [vmem:[#allocation5 + $0x40] sm:$0xff]  ;;  %v92_v8 = vld [vmem:[#allocation5 + $0x50] sm:$0xff]  ;;  %s2007_s14 = sshll.u32 %s2395_s13, 4  ;;  %s2008_s14 = int_to_ptr.vmem [resolvable:$true] %s2007_s14 }
  0x29   :  { %170 = vmatpush1.msra.mxu0 %v94_v3  ;;  %283 = vmatpush1.msra.mxu1 %v96_v4  ;;  %v87_v9 = vld [vmem:[#allocation5 + $0x28] sm:$0xff]  ;;  %v89_v10 = vld [vmem:[#allocation5 + $0x38] sm:$0xff]  ;;  %v86_v11 = vld [vmem:[#allocation5 + $0x20] sm:$0xff]  ;;  %s2361_s15 = scalar_lea.vmem %s2008_s14, 128  ;;  %p2366_p2 = scmp.lt.s32.totalorder %s2008_s14, %s2008_s14 }
  0x2a   :  { %171 = vmatprep.subr.mxu0 %v91_v5  ;;  %284 = vmatprep.subr.mxu1 %v93_v6  ;;  %v88_v12 = vld [vmem:[#allocation5 + $0x30] sm:$0xff]  ;;  %v83_v13 = vld [vmem:[#allocation5 + $0x8] sm:$0xff]  ;;  %v85_v14 = vld [vmem:[#allocation5 + $0x18] sm:$0xff]  ;;  %p2362_p1 = scmp.ne.s32.totalorder %s2008_s14, %s2361_s15  ;;  %p2367_p3 = scmp.lt.s32.totalorder %s2361_s15, %s2361_s15 }
  0x2b   :  { %172 = vmatpush1.msra.mxu0 %v90_v7  ;;  %285 = vmatpush1.msra.mxu1 %v92_v8  ;;  %v82_v15 = vld [vmem:[#allocation5] sm:$0xff]  ;;  %v84_v16 = vld [vmem:[#allocation5 + $0x10] sm:$0xff]  ;;  %v2450_v18 = vld [vmem:[#allocation8 + $0x1e8] sm:$0xff] }
  0x2c   :  { %173 = vmatprep.subr.mxu0 %v87_v9  ;;  %286 = vmatprep.subr.mxu1 %v89_v10  ;;  %v74_v17 = vld [vmem:[%s3443_s0] sm:$0xff]  ;;  %3539 = vst [vmem:[#allocation15_spill] sm:$0xff] %v2450_v18  ;;  %v2452_v19 = vld [vmem:[#allocation8 + $0x1f8] sm:$0xff]  ;;  %v2456_v21 = vld [vmem:[#allocation8 + $0x1f0] sm:$0xff]  ;;  %p2368_p4 = por %p2367_p3, %p2366_p2 }
  0x2d   :  { %174 = vmatpush1.msra.mxu0 %v86_v11  ;;  %287 = vmatpush1.msra.mxu1 %v88_v12  ;;  %3540 = vst [vmem:[#allocation16_spill] sm:$0xff] %v2452_v19  ;;  %v2454_v20 = vld [vmem:[#allocation8 + $0x1e0] sm:$0xff]  ;;  %v2460_v22 = vld [vmem:[#allocation8 + $0x1c8] sm:$0xff]  ;;  %v2462_v23 = vld [vmem:[#allocation8 + $0x1d8] sm:$0xff] }
  0x2e   :  { %175 = vmatprep.subr.mxu0 %v83_v13  ;;  %288 = vmatprep.subr.mxu1 %v85_v14  ;;  %v2468_v24 = vld [vmem:[#allocation8 + $0x1c0] sm:$0xff]  ;;  %v2470_v25 = vld [vmem:[#allocation8 + $0x1d0] sm:$0xff]  ;;  %v75_v26 = vld [vmem:[%s3443_s0 + $0x8] sm:$0xff]  ;;  %p2369_p5 = pnand %p2368_p4, %p2362_p1 }
  0x2f   :  { %176 = vmatpush1.msra.mxu0 %v82_v15  ;;  %289 = vmatpush1.msra.mxu1 %v84_v16  ;;  %v2479_v27 = vld [vmem:[#allocation8 + $0x1a8] sm:$0xff]  ;;  %v2481_v28 = vld [vmem:[#allocation8 + $0x1b8] sm:$0xff]  ;;  %v2485_v29 = vld [vmem:[#allocation8 + $0x1a0] sm:$0xff] }
  0x30   :  { %2024 = vmatmul.mubr.msk.f32.vlgmr.msra.gmra.mxu0 %vm120_vm0, %v74_v17  ;;  %2032 = vmatmul.mubr.msk.f32.vlgmr.msra.gmra.mxu1 %vm120_vm0, %v74_v17  ;;  %v2487_v30 = vld [vmem:[#allocation8 + $0x1b0] sm:$0xff]  ;;  %v2491_v31 = vld [vmem:[#allocation8 + $0x188] sm:$0xff]  ;;  %v2493_v32 = vld [vmem:[#allocation8 + $0x198] sm:$0xff] }
  0x31   :  { %476 = vmatprep.subr.mxu0 %v2450_v18  ;;  %547 = vmatprep.subr.mxu1 %v2452_v19  ;;  %v2499_v33 = vld [vmem:[#allocation8 + $0x180] sm:$0xff]  ;;  %v2501_v34 = vld [vmem:[#allocation8 + $0x190] sm:$0xff]  ;;  %v2510_v36 = vld [vmem:[#allocation8 + $0x168] sm:$0xff] }
  0x32   :  { %477 = vmatpush1.msra.mxu0 %v2454_v20  ;;  %548 = vmatpush1.msra.mxu1 %v2456_v21  ;;  %v76_v35 = vld [vmem:[%s3443_s0 + $0x10] sm:$0xff]  ;;  %v2512_v37 = vld [vmem:[#allocation8 + $0x178] sm:$0xff]  ;;  %v2516_v38 = vld [vmem:[#allocation8 + $0x160] sm:$0xff] }
  0x33   :  { %478 = vmatprep.subr.mxu0 %v2460_v22  ;;  %549 = vmatprep.subr.mxu1 %v2462_v23  ;;  %v2518_v39 = vld [vmem:[#allocation8 + $0x170] sm:$0xff]  ;;  %v2522_v40 = vld [vmem:[#allocation8 + $0x148] sm:$0xff]  ;;  %v2524_v41 = vld [vmem:[#allocation8 + $0x158] sm:$0xff] }
  0x34   :  { %215 = vmatprep.mubr.f32.mxu0 %v3451_v0  ;;  %328 = vmatprep.mubr.f32.mxu1 %v3451_v0  ;;  %v2530_v42 = vld [vmem:[#allocation8 + $0x140] sm:$0xff]  ;;  %v2532_v43 = vld [vmem:[#allocation8 + $0x150] sm:$0xff]  ;;  %v77_v44 = vld [vmem:[%s3443_s0 + $0x18] sm:$0xff] }
  0x35   :  { %479 = vmatpush1.msra.mxu0 %v2468_v24  ;;  %550 = vmatpush1.msra.mxu1 %v2470_v25  ;;  %v2541_v45 = vld [vmem:[#allocation8 + $0x128] sm:$0xff]  ;;  %v2543_v46 = vld [vmem:[#allocation8 + $0x138] sm:$0xff]  ;;  %v2547_v47 = vld [vmem:[#allocation8 + $0x120] sm:$0xff] }
  0x36   :  { %2025 = vmatmul.mubr.msk.f32.gmra.mxu0 %vm120_vm0, %v75_v26  ;;  %2033 = vmatmul.mubr.msk.f32.gmra.mxu1 %vm120_vm0, %v75_v26  ;;  %v2549_v48 = vld [vmem:[#allocation8 + $0x130] sm:$0xff]  ;;  %v2553_v49 = vld [vmem:[#allocation8 + $0x108] sm:$0xff]  ;;  %v2555_v50 = vld [vmem:[#allocation8 + $0x118] sm:$0xff] }
  0x37   :  { %480 = vmatprep.subr.mxu0 %v2479_v27  ;;  %551 = vmatprep.subr.mxu1 %v2481_v28  ;;  %v2561_v51 = vld [vmem:[#allocation8 + $0x100] sm:$0xff]  ;;  %v2563_v52 = vld [vmem:[#allocation8 + $0x110] sm:$0xff]  ;;  %v2572_v54 = vld [vmem:[#allocation8 + $0xe8] sm:$0xff] }
  0x38   :  { %481 = vmatpush1.msra.mxu0 %v2485_v29  ;;  %552 = vmatpush1.msra.mxu1 %v2487_v30  ;;  %v78_v53 = vld [vmem:[%s3443_s0 + $0x20] sm:$0xff]  ;;  %v2574_v55 = vld [vmem:[#allocation8 + $0xf8] sm:$0xff]  ;;  %v2580_v57 = vld [vmem:[#allocation8 + $0xf0] sm:$0xff] }
  0x39   :  { %482 = vmatprep.subr.mxu0 %v2491_v31  ;;  %553 = vmatprep.subr.mxu1 %v2493_v32  ;;  %v2578_v56 = vld [vmem:[#allocation8 + $0xe0] sm:$0xff]  ;;  %v2584_v58 = vld [vmem:[#allocation8 + $0xc8] sm:$0xff]  ;;  %v2586_v59 = vld [vmem:[#allocation8 + $0xd8] sm:$0xff] }
  0x3a   :  { %221 = vmatprep.mubr.f32.mxu0 %v3451_v0  ;;  %334 = vmatprep.mubr.f32.mxu1 %v3451_v0  ;;  %v2592_v60 = vld [vmem:[#allocation8 + $0xc0] sm:$0xff]  ;;  %v2594_v61 = vld [vmem:[#allocation8 + $0xd0] sm:$0xff]  ;;  %v79_v62 = vld [vmem:[%s3443_s0 + $0x28] sm:$0xff] }
  0x3b   :  { %483 = vmatpush1.msra.mxu0 %v2499_v33  ;;  %554 = vmatpush1.msra.mxu1 %v2501_v34  ;;  %v2603_v63 = vld [vmem:[#allocation8 + $0xa8] sm:$0xff]  ;;  %v2605_v1 = vld [vmem:[#allocation8 + $0xb8] sm:$0xff]  ;;  %v2609_v2 = vld [vmem:[#allocation8 + $0xa0] sm:$0xff] }
  0x3c   :  { %2026 = vmatmul.mubr.msk.f32.gmra.mxu0 %vm120_vm0, %v76_v35  ;;  %2034 = vmatmul.mubr.msk.f32.gmra.mxu1 %vm120_vm0, %v76_v35  ;;  %v2611_v3 = vld [vmem:[#allocation8 + $0xb0] sm:$0xff]  ;;  %v2615_v4 = vld [vmem:[#allocation8 + $0x88] sm:$0xff]  ;;  %v2617_v5 = vld [vmem:[#allocation8 + $0x98] sm:$0xff] }
  0x3d   :  { %484 = vmatprep.subr.mxu0 %v2510_v36  ;;  %555 = vmatprep.subr.mxu1 %v2512_v37  ;;  %3541 = vst [vmem:[#allocation17_spill] sm:$0xff] %v2615_v4  ;;  %3542 = vst [vmem:[#allocation18_spill] sm:$0xff] %v2617_v5  ;;  %v2623_v6 = vld [vmem:[#allocation8 + $0x80] sm:$0xff]  ;;  %v2625_v7 = vld [vmem:[#allocation8 + $0x90] sm:$0xff] }
  0x3e   :  { %485 = vmatpush1.msra.mxu0 %v2516_v38  ;;  %556 = vmatpush1.msra.mxu1 %v2518_v39  ;;  %3543 = vst [vmem:[#allocation19_spill] sm:$0xff] %v2623_v6  ;;  %3544 = vst [vmem:[#allocation20_spill] sm:$0xff] %v2625_v7  ;;  %v80_v8 = vld [vmem:[%s3443_s0 + $0x30] sm:$0xff]  ;;  %v2634_v9 = vld [vmem:[#allocation8 + $0x68] sm:$0xff] }
  0x3f   :  { %486 = vmatprep.subr.mxu0 %v2522_v40  ;;  %557 = vmatprep.subr.mxu1 %v2524_v41  ;;  %3545 = vst [vmem:[#allocation21_spill] sm:$0xff] %v2634_v9  ;;  %v2636_v10 = vld [vmem:[#allocation8 + $0x78] sm:$0xff]  ;;  %v2640_v11 = vld [vmem:[#allocation8 + $0x60] sm:$0xff]  ;;  %v2642_v12 = vld [vmem:[#allocation8 + $0x70] sm:$0xff] }
  0x40   :  { %227 = vmatprep.mubr.f32.mxu0 %v3451_v0  ;;  %340 = vmatprep.mubr.f32.mxu1 %v3451_v0  ;;  %3546 = vst [vmem:[#allocation22_spill] sm:$0xff] %v2636_v10  ;;  %3547 = vst [vmem:[#allocation23_spill] sm:$0xff] %v2640_v11  ;;  %v2646_v13 = vld [vmem:[#allocation8 + $0x48] sm:$0xff]  ;;  %v2648_v14 = vld [vmem:[#allocation8 + $0x58] sm:$0xff] }
  0x41   :  { %487 = vmatpush1.msra.mxu0 %v2530_v42  ;;  %558 = vmatpush1.msra.mxu1 %v2532_v43  ;;  %3548 = vst [vmem:[#allocation24_spill] sm:$0xff] %v2642_v12  ;;  %3549 = vst [vmem:[#allocation25_spill] sm:$0xff] %v2646_v13  ;;  %v2654_v15 = vld [vmem:[#allocation8 + $0x40] sm:$0xff]  ;;  %v2656_v16 = vld [vmem:[#allocation8 + $0x50] sm:$0xff] }
  0x42   :  { %2027 = vmatmul.mubr.msk.f32.gmra.mxu0 %vm120_vm0, %v77_v44  ;;  %2035 = vmatmul.mubr.msk.f32.gmra.mxu1 %vm120_vm0, %v77_v44  ;;  %3550 = vst [vmem:[#allocation26_spill] sm:$0xff] %v2648_v14  ;;  %3551 = vst [vmem:[#allocation27_spill] sm:$0xff] %v2654_v15  ;;  %v81_v17 = vld [vmem:[%s3443_s0 + $0x38] sm:$0xff]  ;;  %v2665_v26 = vld [vmem:[#allocation8 + $0x28] sm:$0xff] }
  0x43   :  { %488 = vmatprep.subr.mxu0 %v2541_v45  ;;  %559 = vmatprep.subr.mxu1 %v2543_v46  ;;  %3552 = vst [vmem:[#allocation28_spill] sm:$0xff] %v2656_v16  ;;  %3553 = vst [vmem:[#allocation29_spill] sm:$0xff] %v2665_v26  ;;  %v2667_v35 = vld [vmem:[#allocation8 + $0x38] sm:$0xff]  ;;  %v2671_v44 = vld [vmem:[#allocation8 + $0x20] sm:$0xff] }
  0x44   :  { %489 = vmatpush1.msra.mxu0 %v2547_v47  ;;  %560 = vmatpush1.msra.mxu1 %v2549_v48  ;;  %3554 = vst [vmem:[#allocation30_spill] sm:$0xff] %v2667_v35  ;;  %3555 = vst [vmem:[#allocation31_spill] sm:$0xff] %v2671_v44 }
  0x45   :  { %490 = vmatprep.subr.mxu0 %v2553_v49  ;;  %561 = vmatprep.subr.mxu1 %v2555_v50 }
  0x46   :  { %233 = vmatprep.mubr.f32.mxu0 %v3451_v0  ;;  %346 = vmatprep.mubr.f32.mxu1 %v3451_v0 }
  0x47   :  { %491 = vmatpush1.msra.mxu0 %v2561_v51  ;;  %562 = vmatpush1.msra.mxu1 %v2563_v52 }
  0x48   :  { %2028 = vmatmul.mubr.msk.f32.gmra.mxu0 %vm120_vm0, %v78_v53  ;;  %2036 = vmatmul.mubr.msk.f32.gmra.mxu1 %vm120_vm0, %v78_v53  ;;  %v2673_v53 = vld [vmem:[#allocation8 + $0x30] sm:$0xff] }
  0x49   :  { %492 = vmatprep.subr.mxu0 %v2572_v54  ;;  %563 = vmatprep.subr.mxu1 %v2574_v55  ;;  %3556 = vst [vmem:[#allocation32_spill] sm:$0xff] %v2673_v53 }
  0x4a   :  { %493 = vmatpush1.msra.mxu0 %v2578_v56  ;;  %564 = vmatpush1.msra.mxu1 %v2580_v57 }
  0x4b   :  { %494 = vmatprep.subr.mxu0 %v2584_v58  ;;  %565 = vmatprep.subr.mxu1 %v2586_v59 }
  0x4c   :  { %239 = vmatprep.mubr.f32.mxu0 %v3451_v0  ;;  %352 = vmatprep.mubr.f32.mxu1 %v3451_v0 }
  0x4d   :  { %495 = vmatpush1.msra.mxu0 %v2592_v60  ;;  %566 = vmatpush1.msra.mxu1 %v2594_v61 }
  0x4e   :  { %2029 = vmatmul.mubr.msk.f32.gmra.mxu0 %vm120_vm0, %v79_v62  ;;  %2037 = vmatmul.mubr.msk.f32.gmra.mxu1 %vm120_vm0, %v79_v62  ;;  %v2677_v62 = vld [vmem:[#allocation8 + $0x8] sm:$0xff] }
  0x4f   :  { %496 = vmatprep.subr.mxu0 %v2603_v63  ;;  %567 = vmatprep.subr.mxu1 %v2605_v1  ;;  %3557 = vst [vmem:[#allocation33_spill] sm:$0xff] %v2677_v62 }
  0x50   :  { %497 = vmatpush1.msra.mxu0 %v2609_v2  ;;  %568 = vmatpush1.msra.mxu1 %v2611_v3 }
  0x51   :  { %498 = vmatprep.subr.mxu0 %v2615_v4  ;;  %569 = vmatprep.subr.mxu1 %v2617_v5 }
  0x52   :  { %245 = vmatprep.mubr.f32.mxu0 %v3451_v0  ;;  %358 = vmatprep.mubr.f32.mxu1 %v3451_v0 }
  0x53   :  { %499 = vmatpush1.msra.mxu0 %v2623_v6  ;;  %570 = vmatpush1.msra.mxu1 %v2625_v7 }
  0x54   :  { %2030 = vmatmul.mubr.msk.f32.gmra.mxu0 %vm120_vm0, %v80_v8  ;;  %2038 = vmatmul.mubr.msk.f32.gmra.mxu1 %vm120_vm0, %v80_v8  ;;  %v2679_v8 = vld [vmem:[#allocation8 + $0x18] sm:$0xff] }
  0x55   :  { %500 = vmatprep.subr.mxu0 %v2634_v9  ;;  %571 = vmatprep.subr.mxu1 %v2636_v10  ;;  %3558 = vst [vmem:[#allocation34_spill] sm:$0xff] %v2679_v8 }
  0x56   :  { %501 = vmatpush1.msra.mxu0 %v2640_v11  ;;  %572 = vmatpush1.msra.mxu1 %v2642_v12 }
  0x57   :  { %502 = vmatprep.subr.mxu0 %v2646_v13  ;;  %573 = vmatprep.subr.mxu1 %v2648_v14 }
  0x58   :  { %251 = vmatprep.mubr.f32.mxu0 %v3451_v0  ;;  %364 = vmatprep.mubr.f32.mxu1 %v3451_v0  ;;  %v2683_v0 = vld [vmem:[#allocation8] sm:$0xff] }
  0x59   :  { %503 = vmatpush1.msra.mxu0 %v2654_v15  ;;  %574 = vmatpush1.msra.mxu1 %v2656_v16  ;;  %3559 = vst [vmem:[#allocation35_spill] sm:$0xff] %v2683_v0  ;;  %v2687_v16 = vld [vmem:[#allocation8 + $0x10] sm:$0xff] }
  0x5a   :  { %2031 = vmatmul.mubr.msk.f32.gmra.mxu0 %vm120_vm0, %v81_v17  ;;  %2039 = vmatmul.mubr.msk.f32.gmra.mxu1 %vm120_vm0, %v81_v17  ;;  %3560 = vst [vmem:[#allocation36_spill] sm:$0xff] %v2687_v16  ;;  %v3561_v17 = vmov 0.0  }
  0x5b   :  { %504 = vmatprep.subr.mxu0 %v2665_v26  ;;  %575 = vmatprep.subr.mxu1 %v2667_v35 }
  0x5c   :  { %505 = vmatpush1.msra.mxu0 %v2671_v44  ;;  %576 = vmatpush1.msra.mxu1 %v2673_v53 }
  0x5d   :  { %506 = vmatprep.subr.mxu0 %v2677_v62  ;;  %577 = vmatprep.subr.mxu1 %v2679_v8 }
  0x5e   :  { %507 = vmatpush1.msra.mxu0 %v2683_v0  ;;  %540 = vmatprep.mubr.f32.mxu0 %v3561_v17 }
  0x5f   :  { %578 = vmatpush1.msra.mxu1 %v2687_v16  ;;  %611 = vmatprep.mubr.f32.mxu1 %v3561_v17 }
  0x60   :  { %541 = vmatmul.mubr.f32.vlgmr.msra.gmra.mxu0 %v3561_v17  ;;  %612 = vmatmul.mubr.f32.vlgmr.msra.gmra.mxu1 %v3561_v17 }
  0x61   :  { %653 = vmatprep.subr.mxu0 %v2450_v18  ;;  %724 = vmatprep.subr.mxu1 %v2452_v19 }
  0x62   :  { %654 = vmatpush1.msra.mxu0 %v2454_v20  ;;  %725 = vmatpush1.msra.mxu1 %v2456_v21 }
  0x63   :  { %655 = vmatprep.subr.mxu0 %v2460_v22  ;;  %726 = vmatprep.subr.mxu1 %v2462_v23 }
  0x64   :  { %656 = vmatpush1.msra.mxu0 %v2468_v24  ;;  %727 = vmatpush1.msra.mxu1 %v2470_v25 }
  0x65   :  { %657 = vmatprep.subr.mxu0 %v2479_v27  ;;  %728 = vmatprep.subr.mxu1 %v2481_v28 }
  0x66   :  { %658 = vmatpush1.msra.mxu0 %v2485_v29  ;;  %729 = vmatpush1.msra.mxu1 %v2487_v30 }
  0x67   :  { %659 = vmatprep.subr.mxu0 %v2491_v31  ;;  %730 = vmatprep.subr.mxu1 %v2493_v32 }
  0x68   :  { %660 = vmatpush1.msra.mxu0 %v2499_v33  ;;  %731 = vmatpush1.msra.mxu1 %v2501_v34 }
  0x69   :  { %661 = vmatprep.subr.mxu0 %v2510_v36  ;;  %732 = vmatprep.subr.mxu1 %v2512_v37 }
  0x6a   :  { %662 = vmatpush1.msra.mxu0 %v2516_v38  ;;  %733 = vmatpush1.msra.mxu1 %v2518_v39 }
  0x6b   :  { %663 = vmatprep.subr.mxu0 %v2522_v40  ;;  %734 = vmatprep.subr.mxu1 %v2524_v41 }
  0x6c   :  { %664 = vmatpush1.msra.mxu0 %v2530_v42  ;;  %735 = vmatpush1.msra.mxu1 %v2532_v43 }
  0x6d   :  { %665 = vmatprep.subr.mxu0 %v2541_v45  ;;  %736 = vmatprep.subr.mxu1 %v2543_v46 }
  0x6e   :  { %666 = vmatpush1.msra.mxu0 %v2547_v47  ;;  %737 = vmatpush1.msra.mxu1 %v2549_v48 }
  0x6f   :  { %667 = vmatprep.subr.mxu0 %v2553_v49  ;;  %738 = vmatprep.subr.mxu1 %v2555_v50 }
  0x70   :  { %668 = vmatpush1.msra.mxu0 %v2561_v51  ;;  %739 = vmatpush1.msra.mxu1 %v2563_v52 }
  0x71   :  { %669 = vmatprep.subr.mxu0 %v2572_v54  ;;  %740 = vmatprep.subr.mxu1 %v2574_v55 }
  0x72   :  { %670 = vmatpush1.msra.mxu0 %v2578_v56  ;;  %741 = vmatpush1.msra.mxu1 %v2580_v57 }
  0x73   :  { %671 = vmatprep.subr.mxu0 %v2584_v58  ;;  %742 = vmatprep.subr.mxu1 %v2586_v59 }
  0x74   :  { %672 = vmatpush1.msra.mxu0 %v2592_v60  ;;  %743 = vmatpush1.msra.mxu1 %v2594_v61 }
  0x75   :  { %673 = vmatprep.subr.mxu0 %v2603_v63  ;;  %744 = vmatprep.subr.mxu1 %v2605_v1 }
  0x76   :  { %674 = vmatpush1.msra.mxu0 %v2609_v2  ;;  %745 = vmatpush1.msra.mxu1 %v2611_v3 }
  0x77   :  { %675 = vmatprep.subr.mxu0 %v2615_v4  ;;  %746 = vmatprep.subr.mxu1 %v2617_v5  ;;  %v3562_v4 = vld [vmem:[#allocation28_spill] sm:$0xff] }
  0x78   :  { %676 = vmatpush1.msra.mxu0 %v2623_v6  ;;  %747 = vmatpush1.msra.mxu1 %v2625_v7 }
  0x79   :  { %677 = vmatprep.subr.mxu0 %v2634_v9  ;;  %748 = vmatprep.subr.mxu1 %v2636_v10 }
  0x7a   :  { %678 = vmatpush1.msra.mxu0 %v2640_v11  ;;  %749 = vmatpush1.msra.mxu1 %v2642_v12 }
  0x7b   :  { %679 = vmatprep.subr.mxu0 %v2646_v13  ;;  %750 = vmatprep.subr.mxu1 %v2648_v14 }
  0x7c   :  { %680 = vmatpush1.msra.mxu0 %v2654_v15  ;;  %751 = vmatpush1.msra.mxu1 %v3562_v4 }
  0x7d   :  { %681 = vmatprep.subr.mxu0 %v2665_v26  ;;  %752 = vmatprep.subr.mxu1 %v2667_v35  ;;  %v100_v35 = vlaneseq }
  0x7e   :  { %682 = vmatpush1.msra.mxu0 %v2671_v44  ;;  %753 = vmatpush1.msra.mxu1 %v2673_v53 }
  0x7f   :  { %683 = vmatprep.subr.mxu0 %v2677_v62  ;;  %754 = vmatprep.subr.mxu1 %v2679_v8  ;;  %v101_v44 = vshrl.u32 %v100_v35, 7 }
  0x80   :  { %684 = vmatpush1.msra.mxu0 %v2683_v0  ;;  %717 = vmatprep.mubr.f32.mxu0 %v3561_v17  ;;  %v98_v0 = vld [vmem:[%s3447_s4] sm:$0xf] }
  0x81   :  { %755 = vmatpush1.msra.mxu1 %v2687_v16  ;;  %788 = vmatprep.mubr.f32.mxu1 %v3561_v17  ;;  %v102_v62 = vsub.s32 0, %v101_v44  ;;  %v110_v8 = vsub.s32 2, %v101_v44  ;;  %v106_v17 = vsub.s32 1, %v101_v44 }
  0x82   :  { %830 = vmatprep.subr.mxu0 %v2450_v18  ;;  %901 = vmatprep.subr.mxu1 %v2452_v19  ;;  %v114_v18 = vsub.s32 3, %v101_v44 }
  0x83   :  { %v103_v15 = vrot.slane %v98_v0, %v102_v62  ;;  %v2776_v19 = vrot.slane %v98_v0, %v110_v8  ;;  %v107_v13 = vrot.slane %v98_v0, %v106_v17 }
  0x84   :  { %v2778_v12 = vrot.slane %v98_v0, %v114_v18 }
  0xf0   :  { %v2765_v26 = vpop.f32.mrf.mxu0  ;;  %v2767_v53 = vpop.f32.mrf.mxu1 }
  0xf2   :  { %v2772_v4 = vpop.f32.mrf.mxu0  ;;  %v2774_v16 = vpop.f32.mrf.mxu1 }
  0xf6   :  { %v217_v35 = vpop.f32.mrf.mxu0  ;;  %v330_v14 = vpop.f32.mrf.mxu1 }
  0xf7   :  { %v2780_v11 = vadd.f32 %v217_v35, %v103_v15  ;;  %v2783_v10 = vadd.f32 %v330_v14, %v2776_v19 }
  0xf8   :  { %v219_v9 = vpop.f32.mrf.mxu0  ;;  %v332_v7 = vpop.f32.mrf.mxu1 }
  0xf9   :  { %3563 = vst [vmem:[#allocation37_spill] sm:$0xff] %v2780_v11  ;;  %3564 = vst [vmem:[#allocation38_spill] sm:$0xff] %v2783_v10  ;;  %v2785_v6 = vadd.f32 %v219_v9, %v107_v13  ;;  %v2788_v5 = vadd.f32 %v332_v7, %v2778_v12 }
  0xfb   :  { %3565 = vst [vmem:[#allocation39_spill] sm:$0xff] %v2785_v6  ;;  %3566 = vst [vmem:[#allocation40_spill] sm:$0xff] %v2788_v5 }
  0xfc   :  { %v223_v44 = vpop.f32.mrf.mxu0  ;;  %v336_v62 = vpop.f32.mrf.mxu1 }
  0xfd   :  { %v2790_v8 = vadd.f32 %v223_v44, %v103_v15  ;;  %v2793_v17 = vadd.f32 %v336_v62, %v2776_v19 }
  0xfe   :  { %v225_v0 = vpop.f32.mrf.mxu0  ;;  %v338_v18 = vpop.f32.mrf.mxu1 }
  0xff   :  { %3567 = vst [vmem:[#allocation41_spill] sm:$0xff] %v2790_v8  ;;  %3568 = vst [vmem:[#allocation42_spill] sm:$0xff] %v2793_v17  ;;  %v2795_v35 = vadd.f32 %v225_v0, %v107_v13  ;;  %v2798_v14 = vadd.f32 %v338_v18, %v2778_v12 }
 0x101   :  { %3569 = vst [vmem:[#allocation43_spill] sm:$0xff] %v2795_v35  ;;  %3570 = vst [vmem:[#allocation44_spill] sm:$0xff] %v2798_v14 }
 0x102   :  { %v229_v10 = vpop.f32.mrf.mxu0  ;;  %v342_v9 = vpop.f32.mrf.mxu1 }
 0x103   :  { %v2800_v6 = vadd.f32 %v229_v10, %v103_v15  ;;  %v2803_v7 = vadd.f32 %v342_v9, %v2776_v19 }
 0x104   :  { %v231_v5 = vpop.f32.mrf.mxu0  ;;  %v344_v44 = vpop.f32.mrf.mxu1 }
 0x105   :  { %3571 = vst [vmem:[#allocation45_spill] sm:$0xff] %v2800_v6  ;;  %3572 = vst [vmem:[#allocation46_spill] sm:$0xff] %v2803_v7  ;;  %v2805_v8 = vadd.f32 %v231_v5, %v107_v13  ;;  %v2808_v62 = vadd.f32 %v344_v44, %v2778_v12 }
 0x107   :  { %3573 = vst [vmem:[#allocation47_spill] sm:$0xff] %v2805_v8  ;;  %3574 = vst [vmem:[#allocation48_spill] sm:$0xff] %v2808_v62 }
 0x108   :  { %v235_v17 = vpop.f32.mrf.mxu0  ;;  %v348_v0 = vpop.f32.mrf.mxu1 }
 0x109   :  { %v2810_v35 = vadd.f32 %v235_v17, %v103_v15  ;;  %v2813_v18 = vadd.f32 %v348_v0, %v2776_v19 }
 0x10a   :  { %v237_v14 = vpop.f32.mrf.mxu0  ;;  %v350_v10 = vpop.f32.mrf.mxu1 }
 0x10b   :  { %3575 = vst [vmem:[#allocation49_spill] sm:$0xff] %v2810_v35  ;;  %3576 = vst [vmem:[#allocation50_spill] sm:$0xff] %v2813_v18  ;;  %v2815_v6 = vadd.f32 %v237_v14, %v107_v13  ;;  %v2818_v9 = vadd.f32 %v350_v10, %v2778_v12 }
 0x10d   :  { %3577 = vst [vmem:[#allocation51_spill] sm:$0xff] %v2815_v6  ;;  %3578 = vst [vmem:[#allocation52_spill] sm:$0xff] %v2818_v9 }
 0x10e   :  { %v241_v7 = vpop.f32.mrf.mxu0  ;;  %v354_v5 = vpop.f32.mrf.mxu1 }
 0x10f   :  { %v2820_v8 = vadd.f32 %v241_v7, %v103_v15  ;;  %v2823_v44 = vadd.f32 %v354_v5, %v2776_v19 }
 0x110   :  { %v243_v62 = vpop.f32.mrf.mxu0  ;;  %v356_v17 = vpop.f32.mrf.mxu1 }
 0x111   :  { %3579 = vst [vmem:[#allocation53_spill] sm:$0xff] %v2820_v8  ;;  %3580 = vst [vmem:[#allocation54_spill] sm:$0xff] %v2823_v44  ;;  %v2825_v35 = vadd.f32 %v243_v62, %v107_v13  ;;  %v2828_v0 = vadd.f32 %v356_v17, %v2778_v12 }
 0x113   :  { %3581 = vst [vmem:[#allocation55_spill] sm:$0xff] %v2825_v35  ;;  %3582 = vst [vmem:[#allocation56_spill] sm:$0xff] %v2828_v0 }
 0x114   :  { %v247_v18 = vpop.f32.mrf.mxu0  ;;  %v360_v14 = vpop.f32.mrf.mxu1 }
 0x115   :  { %v2830_v6 = vadd.f32 %v247_v18, %v103_v15  ;;  %v2833_v10 = vadd.f32 %v360_v14, %v2776_v19 }
 0x116   :  { %v249_v9 = vpop.f32.mrf.mxu0  ;;  %v362_v7 = vpop.f32.mrf.mxu1 }
 0x117   :  { %3583 = vst [vmem:[#allocation57_spill] sm:$0xff] %v2830_v6  ;;  %3584 = vst [vmem:[#allocation58_spill] sm:$0xff] %v2833_v10  ;;  %v2835_v8 = vadd.f32 %v249_v9, %v107_v13  ;;  %v2838_v5 = vadd.f32 %v362_v7, %v2778_v12  ;;  %v212_v9 = vadd.f32 %v2765_v26, %v103_v15 }
 0x118   :  { %v214_v7 = vadd.f32 %v2772_v4, %v107_v13 }
 0x119   :  { %3585 = vst [vmem:[#allocation59_spill] sm:$0xff] %v2835_v8  ;;  %3586 = vst [vmem:[#allocation60_spill] sm:$0xff] %v2838_v5 }
 0x11a   :  { %v253_v44 = vpop.f32.mrf.mxu0  ;;  %v366_v62 = vpop.f32.mrf.mxu1 }
 0x11b   :  { %v2840_v35 = vadd.f32 %v253_v44, %v103_v15  ;;  %v2843_v17 = vadd.f32 %v366_v62, %v2776_v19 }
 0x11c   :  { %v255_v0 = vpop.f32.mrf.mxu0  ;;  %v368_v18 = vpop.f32.mrf.mxu1 }
 0x11d   :  { %3587 = vst [vmem:[#allocation61_spill] sm:$0xff] %v2840_v35  ;;  %3588 = vst [vmem:[#allocation62_spill] sm:$0xff] %v2843_v17  ;;  %v2845_v6 = vadd.f32 %v255_v0, %v107_v13  ;;  %v2848_v14 = vadd.f32 %v368_v18, %v2778_v12  ;;  %v327_v0 = vadd.f32 %v2774_v16, %v2778_v12 }
 0x11e   :  { %v325_v18 = vadd.f32 %v2767_v53, %v2776_v19 }
 0x11f   :  { %3589 = vst [vmem:[#allocation63_spill] sm:$0xff] %v2845_v6  ;;  %3590 = vst [vmem:[#allocation64_spill] sm:$0xff] %v2848_v14 }
 0x120   :  { %v542_v10 = vpop.f32.mrf.mxu0  ;;  %v613_v35 = vpop.f32.mrf.mxu1 }
 0x121   :  { %v618_v5 = vadd.f32 %v542_v10, %v212_v9  ;;  %v620_v14 = vadd.f32 %v613_v35, %v325_v18  ;;  %v3591_v35 = vld [vmem:[#allocation17_spill] sm:$0xff]  ;;  %v3596_v18 = vld [vmem:[#allocation22_spill] sm:$0xff] }
 0x122   :  { %v544_v8 = vpop.f32.mrf.mxu0  ;;  %v615_v17 = vpop.f32.mrf.mxu1 }
 0x123   :  { %v2040_v11 = vmul.f32 -1.442695, %v618_v5  ;;  %v619_v44 = vadd.f32 %v544_v8, %v214_v7  ;;  %v621_v6 = vadd.f32 %v615_v17, %v327_v0  ;;  %v3595_v0 = vld [vmem:[#allocation21_spill] sm:$0xff] }
 0x125   :  { %2109 = vpow2.f32 %v2040_v11  ;;  %v2041_v62 = vmul.f32 -1.442695, %v619_v44  ;;  %v2042_v15 = vmul.f32 -1.442695, %v621_v6  ;;  %v3593_v44 = vld [vmem:[#allocation19_spill] sm:$0xff] }
 0x127   :  { %2111 = vpow2.f32 %v2041_v62  ;;  %v3594_v62 = vld [vmem:[#allocation20_spill] sm:$0xff] }
 0x128   :  { %2113 = vpow2.f32 %v2042_v15  ;;  %v3597_v15 = vld [vmem:[#allocation23_spill] sm:$0xff] }
 0x132   :  { %v2110_v26 = vpop.eup %2109 }
 0x133   :  { %v625_v4 = vadd.f32 1.0, %v2110_v26  ;;  %v3598_v26 = vld [vmem:[#allocation24_spill] sm:$0xff] }
 0x134   :  { %v2112_v13 = vpop.eup %2111 }
 0x135   :  { %2115 = vrcp.f32 %v625_v4  ;;  %v631_v8 = vadd.f32 1.0, %v2112_v13  ;;  %v2114_v11 = vpop.eup %2113  ;;  %v3599_v4 = vld [vmem:[#allocation25_spill] sm:$0xff]  ;;  %v3600_v13 = vld [vmem:[#allocation26_spill] sm:$0xff] }
 0x136   :  { %2117 = vtanh.f32 %v620_v14  ;;  %v638_v7 = vadd.f32 1.0, %v2114_v11  ;;  %v3592_v14 = vld [vmem:[#allocation18_spill] sm:$0xff]  ;;  %v3602_v11 = vld [vmem:[#allocation28_spill] sm:$0xff] }
 0x137   :  { %2119 = vrcp.f32 %v631_v8  ;;  %v3601_v8 = vld [vmem:[#allocation27_spill] sm:$0xff] }
 0x138   :  { %2121 = vrcp.f32 %v638_v7  ;;  %v3606_v7 = vld [vmem:[#allocation32_spill] sm:$0xff] }
 0x142   :  { %v2116_v10 = vpop.eup %2115 }
 0x143   :  { %v2118_v5 = vpop.eup %2117 }
 0x144   :  { %v2120_v9 = vpop.eup %2119  ;;  %v642_v16 = vmul.f32 %v2118_v5, %v2116_v10  ;;  %v3603_v10 = vld [vmem:[#allocation29_spill] sm:$0xff]  ;;  %v3604_v5 = vld [vmem:[#allocation30_spill] sm:$0xff] }
 0x145   :  { %v641_v12 = vmul.f32 0.0, %v2120_v9  ;;  %v2122_v19 = vpop.eup %2121  ;;  %v3605_v9 = vld [vmem:[#allocation31_spill] sm:$0xff] }
 0x147   :  { %v2856_v17 = vadd.f32 %v642_v16, %v641_v12  ;;  %v3607_v12 = vld [vmem:[#allocation33_spill] sm:$0xff]  ;;  %v3608_v16 = vld [vmem:[#allocation34_spill] sm:$0xff] }
 0x149   :  { %2123 = vtanh.f32 %v2856_v17 }
 0x156   :  { %v2124_v6 = vpop.eup %2123 }
 0x157   :  { %v645_v53 = vmul.f32 %v2124_v6, %v2122_v19  ;;  %v3609_v19 = vld [vmem:[#allocation35_spill] sm:$0xff]  ;;  %v3610_v6 = vmov 0.0  }
 0x159   :  { %718 = vmatmul.mubr.f32.vlgmr.msra.gmra.mxu0 %v645_v53  ;;  %789 = vmatmul.mubr.f32.vlgmr.msra.gmra.mxu1 %v645_v53  ;;  %v3611_v53 = vld [vmem:[#allocation36_spill] sm:$0xff] }
 0x15a   :  { %831 = vmatpush1.msra.mxu0 %v2454_v20  ;;  %902 = vmatpush1.msra.mxu1 %v2456_v21 }
 0x15b   :  { %832 = vmatprep.subr.mxu0 %v2460_v22  ;;  %903 = vmatprep.subr.mxu1 %v2462_v23 }
 0x15c   :  { %833 = vmatpush1.msra.mxu0 %v2468_v24  ;;  %904 = vmatpush1.msra.mxu1 %v2470_v25 }
 0x15d   :  { %834 = vmatprep.subr.mxu0 %v2479_v27  ;;  %905 = vmatprep.subr.mxu1 %v2481_v28 }
 0x15e   :  { %835 = vmatpush1.msra.mxu0 %v2485_v29  ;;  %906 = vmatpush1.msra.mxu1 %v2487_v30 }
 0x15f   :  { %836 = vmatprep.subr.mxu0 %v2491_v31  ;;  %907 = vmatprep.subr.mxu1 %v2493_v32 }
 0x160   :  { %837 = vmatpush1.msra.mxu0 %v2499_v33  ;;  %908 = vmatpush1.msra.mxu1 %v2501_v34 }
 0x161   :  { %838 = vmatprep.subr.mxu0 %v2510_v36  ;;  %909 = vmatprep.subr.mxu1 %v2512_v37 }
 0x162   :  { %839 = vmatpush1.msra.mxu0 %v2516_v38  ;;  %910 = vmatpush1.msra.mxu1 %v2518_v39 }
 0x163   :  { %840 = vmatprep.subr.mxu0 %v2522_v40  ;;  %911 = vmatprep.subr.mxu1 %v2524_v41 }
 0x164   :  { %841 = vmatpush1.msra.mxu0 %v2530_v42  ;;  %912 = vmatpush1.msra.mxu1 %v2532_v43 }
 0x165   :  { %842 = vmatprep.subr.mxu0 %v2541_v45  ;;  %913 = vmatprep.subr.mxu1 %v2543_v46 }
 0x166   :  { %843 = vmatpush1.msra.mxu0 %v2547_v47  ;;  %914 = vmatpush1.msra.mxu1 %v2549_v48 }
 0x167   :  { %844 = vmatprep.subr.mxu0 %v2553_v49  ;;  %915 = vmatprep.subr.mxu1 %v2555_v50 }
 0x168   :  { %845 = vmatpush1.msra.mxu0 %v2561_v51  ;;  %916 = vmatpush1.msra.mxu1 %v2563_v52 }
 0x169   :  { %846 = vmatprep.subr.mxu0 %v2572_v54  ;;  %917 = vmatprep.subr.mxu1 %v2574_v55 }
 0x16a   :  { %847 = vmatpush1.msra.mxu0 %v2578_v56  ;;  %918 = vmatpush1.msra.mxu1 %v2580_v57 }
 0x16b   :  { %848 = vmatprep.subr.mxu0 %v2584_v58  ;;  %919 = vmatprep.subr.mxu1 %v2586_v59 }
 0x16c   :  { %849 = vmatpush1.msra.mxu0 %v2592_v60  ;;  %920 = vmatpush1.msra.mxu1 %v2594_v61 }
 0x16d   :  { %850 = vmatprep.subr.mxu0 %v2603_v63  ;;  %921 = vmatprep.subr.mxu1 %v2605_v1 }
 0x16e   :  { %851 = vmatpush1.msra.mxu0 %v2609_v2  ;;  %922 = vmatpush1.msra.mxu1 %v2611_v3 }
 0x16f   :  { %852 = vmatprep.subr.mxu0 %v3591_v35  ;;  %923 = vmatprep.subr.mxu1 %v3592_v14 }
 0x170   :  { %853 = vmatpush1.msra.mxu0 %v3593_v44  ;;  %924 = vmatpush1.msra.mxu1 %v3594_v62 }
 0x171   :  { %854 = vmatprep.subr.mxu0 %v3595_v0  ;;  %925 = vmatprep.subr.mxu1 %v3596_v18  ;;  %v3617_v18 = vld [vmem:[#allocation38_spill] sm:$0xff] }
 0x172   :  { %855 = vmatpush1.msra.mxu0 %v3597_v15  ;;  %926 = vmatpush1.msra.mxu1 %v3598_v26  ;;  %v3616_v15 = vld [vmem:[#allocation40_spill] sm:$0xff] }
 0x173   :  { %856 = vmatprep.subr.mxu0 %v3599_v4  ;;  %927 = vmatprep.subr.mxu1 %v3600_v13 }
 0x174   :  { %857 = vmatpush1.msra.mxu0 %v3601_v8  ;;  %928 = vmatpush1.msra.mxu1 %v3602_v11  ;;  %v3612_v11 = vld [vmem:[#allocation15_spill] sm:$0xff] }
 0x175   :  { %858 = vmatprep.subr.mxu0 %v3603_v10  ;;  %929 = vmatprep.subr.mxu1 %v3604_v5  ;;  %v3613_v10 = vld [vmem:[#allocation16_spill] sm:$0xff] }
 0x176   :  { %859 = vmatpush1.msra.mxu0 %v3605_v9  ;;  %930 = vmatpush1.msra.mxu1 %v3606_v7  ;;  %v3614_v9 = vld [vmem:[#allocation37_spill] sm:$0xff] }
 0x177   :  { %860 = vmatprep.subr.mxu0 %v3607_v12  ;;  %931 = vmatprep.subr.mxu1 %v3608_v16  ;;  %v3615_v12 = vld [vmem:[#allocation39_spill] sm:$0xff] }
 0x178   :  { %861 = vmatpush1.msra.mxu0 %v3609_v19  ;;  %894 = vmatprep.mubr.f32.mxu0 %v3610_v6 }
 0x179   :  { %932 = vmatpush1.msra.mxu1 %v3611_v53  ;;  %965 = vmatprep.mubr.f32.mxu1 %v3610_v6 }
 0x17a   :  { %1007 = vmatprep.subr.mxu0 %v3612_v11  ;;  %1078 = vmatprep.subr.mxu1 %v3613_v10 }
 0x219   :  { %v719_v5 = vpop.f32.mrf.mxu0  ;;  %v790_v16 = vpop.f32.mrf.mxu1 }
 0x21a   :  { %v795_v8 = vadd.f32 %v719_v5, %v3614_v9  ;;  %v797_v6 = vadd.f32 %v790_v16, %v3617_v18 }
 0x21b   :  { %v721_v7 = vpop.f32.mrf.mxu0  ;;  %v792_v26 = vpop.f32.mrf.mxu1 }
 0x21c   :  { %v2043_v13 = vmul.f32 -1.442695, %v795_v8  ;;  %v796_v4 = vadd.f32 %v721_v7, %v3615_v12  ;;  %v798_v53 = vadd.f32 %v792_v26, %v3616_v15 }
 0x21e   :  { %2125 = vpow2.f32 %v2043_v13  ;;  %v2044_v19 = vmul.f32 -1.442695, %v796_v4  ;;  %v2045_v0 = vmul.f32 -1.442695, %v798_v53 }
 0x220   :  { %2127 = vpow2.f32 %v2044_v19 }
 0x221   :  { %2129 = vtanh.f32 %v797_v6 }
 0x222   :  { %2131 = vpow2.f32 %v2045_v0 }
 0x22b   :  { %v2126_v11 = vpop.eup %2125 }
 0x22c   :  { %v802_v62 = vadd.f32 1.0, %v2126_v11 }
 0x22d   :  { %v2128_v10 = vpop.eup %2127 }
 0x22e   :  { %2133 = vrcp.f32 %v802_v62  ;;  %v808_v5 = vadd.f32 1.0, %v2128_v10  ;;  %v2130_v8 = vpop.eup %2129  ;;  %v3639_v62 = vld [vmem:[#allocation43_spill] sm:$0xff]  ;;  %v3640_v10 = vld [vmem:[#allocation44_spill] sm:$0xff] }
 0x22f   :  { %v2132_v9 = vpop.eup %2131 }
 0x230   :  { %2135 = vrcp.f32 %v808_v5  ;;  %v815_v12 = vadd.f32 1.0, %v2132_v9 }
 0x232   :  { %2137 = vrcp.f32 %v815_v12 }
 0x23b   :  { %v2134_v13 = vpop.eup %2133 }
 0x23c   :  { %v819_v7 = vmul.f32 %v2134_v13, %v2130_v8  ;;  %v3641_v8 = vld [vmem:[#allocation42_spill] sm:$0xff] }
 0x23d   :  { %v2136_v4 = vpop.eup %2135 }
 0x23e   :  { %v818_v19 = vmul.f32 %v2136_v4, %v2856_v17 }
 0x23f   :  { %v2138_v18 = vpop.eup %2137 }
 0x240   :  { %v2930_v15 = vadd.f32 %v819_v7, %v818_v19 }
 0x242   :  { %2139 = vtanh.f32 %v2930_v15 }
 0x24f   :  { %v2140_v26 = vpop.eup %2139 }
 0x250   :  { %v822_v16 = vmul.f32 %v2140_v26, %v2138_v18 }
 0x252   :  { %895 = vmatmul.mubr.f32.vlgmr.msra.gmra.mxu0 %v822_v16  ;;  %966 = vmatmul.mubr.f32.vlgmr.msra.gmra.mxu1 %v822_v16 }
 0x253   :  { %1008 = vmatpush1.msra.mxu0 %v2454_v20  ;;  %1079 = vmatpush1.msra.mxu1 %v2456_v21  ;;  %v3618_v20 = vld [vmem:[#allocation20_spill] sm:$0xff]  ;;  %v3619_v21 = vld [vmem:[#allocation21_spill] sm:$0xff] }
 0x254   :  { %1009 = vmatprep.subr.mxu0 %v2460_v22  ;;  %1080 = vmatprep.subr.mxu1 %v2462_v23  ;;  %v3620_v22 = vld [vmem:[#allocation22_spill] sm:$0xff]  ;;  %v3621_v23 = vld [vmem:[#allocation23_spill] sm:$0xff] }
 0x255   :  { %1010 = vmatpush1.msra.mxu0 %v2468_v24  ;;  %1081 = vmatpush1.msra.mxu1 %v2470_v25  ;;  %v3622_v24 = vld [vmem:[#allocation24_spill] sm:$0xff]  ;;  %v3623_v25 = vld [vmem:[#allocation25_spill] sm:$0xff] }
 0x256   :  { %1011 = vmatprep.subr.mxu0 %v2479_v27  ;;  %1082 = vmatprep.subr.mxu1 %v2481_v28  ;;  %v3624_v27 = vld [vmem:[#allocation26_spill] sm:$0xff]  ;;  %v3625_v28 = vld [vmem:[#allocation27_spill] sm:$0xff] }
 0x257   :  { %1012 = vmatpush1.msra.mxu0 %v2485_v29  ;;  %1083 = vmatpush1.msra.mxu1 %v2487_v30  ;;  %v3626_v29 = vld [vmem:[#allocation28_spill] sm:$0xff]  ;;  %v3627_v30 = vld [vmem:[#allocation29_spill] sm:$0xff] }
 0x258   :  { %1013 = vmatprep.subr.mxu0 %v2491_v31  ;;  %1084 = vmatprep.subr.mxu1 %v2493_v32  ;;  %v3628_v31 = vld [vmem:[#allocation30_spill] sm:$0xff]  ;;  %v3629_v32 = vld [vmem:[#allocation31_spill] sm:$0xff] }
 0x259   :  { %1014 = vmatpush1.msra.mxu0 %v2499_v33  ;;  %1085 = vmatpush1.msra.mxu1 %v2501_v34  ;;  %v3630_v33 = vld [vmem:[#allocation32_spill] sm:$0xff]  ;;  %v3631_v34 = vld [vmem:[#allocation33_spill] sm:$0xff] }
 0x25a   :  { %1015 = vmatprep.subr.mxu0 %v2510_v36  ;;  %1086 = vmatprep.subr.mxu1 %v2512_v37  ;;  %v3632_v36 = vld [vmem:[#allocation34_spill] sm:$0xff]  ;;  %v3633_v37 = vld [vmem:[#allocation35_spill] sm:$0xff] }
 0x25b   :  { %1016 = vmatpush1.msra.mxu0 %v2516_v38  ;;  %1087 = vmatpush1.msra.mxu1 %v2518_v39  ;;  %v3634_v38 = vmov 0.0   ;;  %v3635_v39 = vld [vmem:[#allocation36_spill] sm:$0xff] }
 0x25c   :  { %1017 = vmatprep.subr.mxu0 %v2522_v40  ;;  %1088 = vmatprep.subr.mxu1 %v2524_v41  ;;  %v2997_v40 = vld [vmem:[#allocation8 + $0x1e8] sm:$0xff]  ;;  %v3000_v41 = vld [vmem:[#allocation8 + $0x1f8] sm:$0xff] }
 0x25d   :  { %1018 = vmatpush1.msra.mxu0 %v2530_v42  ;;  %1089 = vmatpush1.msra.mxu1 %v2532_v43  ;;  %3636 = vst [vmem:[#allocation17_spill] sm:$0xff] %v2997_v40  ;;  %3637 = vst [vmem:[#allocation18_spill] sm:$0xff] %v3000_v41  ;;  %v3638_v43 = vld [vmem:[#allocation41_spill] sm:$0xff] }
 0x25e   :  { %1019 = vmatprep.subr.mxu0 %v2541_v45  ;;  %1090 = vmatprep.subr.mxu1 %v2543_v46 }
 0x25f   :  { %1020 = vmatpush1.msra.mxu0 %v2547_v47  ;;  %1091 = vmatpush1.msra.mxu1 %v2549_v48 }
 0x260   :  { %1021 = vmatprep.subr.mxu0 %v2553_v49  ;;  %1092 = vmatprep.subr.mxu1 %v2555_v50 }
 0x261   :  { %1022 = vmatpush1.msra.mxu0 %v2561_v51  ;;  %1093 = vmatpush1.msra.mxu1 %v2563_v52 }
 0x262   :  { %1023 = vmatprep.subr.mxu0 %v2572_v54  ;;  %1094 = vmatprep.subr.mxu1 %v2574_v55 }
 0x263   :  { %1024 = vmatpush1.msra.mxu0 %v2578_v56  ;;  %1095 = vmatpush1.msra.mxu1 %v2580_v57 }
 0x264   :  { %1025 = vmatprep.subr.mxu0 %v2584_v58  ;;  %1096 = vmatprep.subr.mxu1 %v2586_v59 }
 0x265   :  { %1026 = vmatpush1.msra.mxu0 %v2592_v60  ;;  %1097 = vmatpush1.msra.mxu1 %v2594_v61 }
 0x266   :  { %1027 = vmatprep.subr.mxu0 %v2603_v63  ;;  %1098 = vmatprep.subr.mxu1 %v2605_v1 }
 0x267   :  { %1028 = vmatpush1.msra.mxu0 %v2609_v2  ;;  %1099 = vmatpush1.msra.mxu1 %v2611_v3 }
 0x268   :  { %1029 = vmatprep.subr.mxu0 %v3591_v35  ;;  %1100 = vmatprep.subr.mxu1 %v3592_v14 }
 0x269   :  { %1030 = vmatpush1.msra.mxu0 %v3593_v44  ;;  %1101 = vmatpush1.msra.mxu1 %v3618_v20 }
 0x26a   :  { %1031 = vmatprep.subr.mxu0 %v3619_v21  ;;  %1102 = vmatprep.subr.mxu1 %v3620_v22 }
 0x26b   :  { %1032 = vmatpush1.msra.mxu0 %v3621_v23  ;;  %1103 = vmatpush1.msra.mxu1 %v3622_v24 }
 0x26c   :  { %1033 = vmatprep.subr.mxu0 %v3623_v25  ;;  %1104 = vmatprep.subr.mxu1 %v3624_v27 }
 0x26d   :  { %1034 = vmatpush1.msra.mxu0 %v3625_v28  ;;  %1105 = vmatpush1.msra.mxu1 %v3626_v29 }
 0x26e   :  { %1035 = vmatprep.subr.mxu0 %v3627_v30  ;;  %1106 = vmatprep.subr.mxu1 %v3628_v31 }
 0x26f   :  { %1036 = vmatpush1.msra.mxu0 %v3629_v32  ;;  %1107 = vmatpush1.msra.mxu1 %v3630_v33 }
 0x270   :  { %1037 = vmatprep.subr.mxu0 %v3631_v34  ;;  %1108 = vmatprep.subr.mxu1 %v3632_v36 }
 0x271   :  { %1038 = vmatpush1.msra.mxu0 %v3633_v37  ;;  %1071 = vmatprep.mubr.f32.mxu0 %v3634_v38 }
 0x272   :  { %1109 = vmatpush1.msra.mxu1 %v3635_v39  ;;  %1142 = vmatprep.mubr.f32.mxu1 %v3634_v38 }
 0x273   :  { %1184 = vmatprep.subr.mxu0 %v2997_v40  ;;  %1255 = vmatprep.subr.mxu1 %v3000_v41 }
 0x312   :  { %v896_v42 = vpop.f32.mrf.mxu0  ;;  %v967_v6 = vpop.f32.mrf.mxu1 }
 0x313   :  { %v972_v45 = vadd.f32 %v896_v42, %v3638_v43  ;;  %v974_v9 = vadd.f32 %v967_v6, %v3641_v8  ;;  %v3026_v8 = vld [vmem:[#allocation8 + $0x1d0] sm:$0xff] }
 0x314   :  { %v898_v46 = vpop.f32.mrf.mxu0  ;;  %v969_v11 = vpop.f32.mrf.mxu1 }
 0x315   :  { %v2046_v17 = vmul.f32 -1.442695, %v972_v45  ;;  %v973_v0 = vadd.f32 %v898_v46, %v3639_v62  ;;  %v975_v5 = vadd.f32 %v969_v11, %v3640_v10  ;;  %v3014_v11 = vld [vmem:[#allocation8 + $0x1f0] sm:$0xff]  ;;  %v3017_v10 = vld [vmem:[#allocation8 + $0x1c8] sm:$0xff] }
 0x317   :  { %2141 = vpow2.f32 %v2046_v17  ;;  %v2047_v53 = vmul.f32 -1.442695, %v973_v0  ;;  %v2048_v13 = vmul.f32 -1.442695, %v975_v5  ;;  %v3023_v5 = vld [vmem:[#allocation8 + $0x1c0] sm:$0xff] }
 0x319   :  { %2143 = vpow2.f32 %v2047_v53  ;;  %v3011_v53 = vld [vmem:[#allocation8 + $0x1e0] sm:$0xff] }
 0x31a   :  { %2145 = vtanh.f32 %v974_v9  ;;  %v3029_v9 = vld [vmem:[#allocation8 + $0x1a8] sm:$0xff] }
 0x31b   :  { %2147 = vpow2.f32 %v2048_v13  ;;  %v3032_v13 = vld [vmem:[#allocation8 + $0x1b8] sm:$0xff] }
 0x324   :  { %v2142_v7 = vpop.eup %2141 }
 0x325   :  { %v979_v4 = vadd.f32 1.0, %v2142_v7  ;;  %v3035_v7 = vld [vmem:[#allocation8 + $0x1a0] sm:$0xff] }
 0x326   :  { %v2144_v12 = vpop.eup %2143 }
 0x327   :  { %2149 = vrcp.f32 %v979_v4  ;;  %v985_v19 = vadd.f32 1.0, %v2144_v12  ;;  %v2146_v18 = vpop.eup %2145  ;;  %v3038_v4 = vld [vmem:[#allocation8 + $0x1b0] sm:$0xff]  ;;  %v3041_v12 = vld [vmem:[#allocation8 + $0x188] sm:$0xff] }
 0x328   :  { %v2148_v26 = vpop.eup %2147 }
 0x329   :  { %2151 = vrcp.f32 %v985_v19  ;;  %v992_v45 = vadd.f32 1.0, %v2148_v26  ;;  %v3044_v19 = vld [vmem:[#allocation8 + $0x198] sm:$0xff]  ;;  %v3050_v26 = vld [vmem:[#allocation8 + $0x190] sm:$0xff] }
 0x32b   :  { %2153 = vrcp.f32 %v992_v45  ;;  %v3062_v45 = vld [vmem:[#allocation8 + $0x170] sm:$0xff] }
 0x32c   :  { %3643 = vst [vmem:[#allocation15_spill] sm:$0xff] %v3062_v45 }
 0x334   :  { %v2150_v16 = vpop.eup %2149 }
 0x335   :  { %v996_v42 = vmul.f32 %v2150_v16, %v2146_v18  ;;  %v3047_v18 = vld [vmem:[#allocation8 + $0x180] sm:$0xff]  ;;  %v3053_v16 = vld [vmem:[#allocation8 + $0x168] sm:$0xff] }
 0x336   :  { %v2152_v43 = vpop.eup %2151 }
 0x337   :  { %v995_v46 = vmul.f32 %v2152_v43, %v2930_v15  ;;  %v3020_v15 = vld [vmem:[#allocation8 + $0x1d8] sm:$0xff]  ;;  %v3059_v43 = vld [vmem:[#allocation8 + $0x160] sm:$0xff] }
 0x338   :  { %v2154_v62 = vpop.eup %2153  ;;  %3642 = vst [vmem:[#allocation19_spill] sm:$0xff] %v3059_v43 }
 0x339   :  { %v3008_v17 = vadd.f32 %v996_v42, %v995_v46  ;;  %v3056_v42 = vld [vmem:[#allocation8 + $0x178] sm:$0xff]  ;;  %v3065_v46 = vld [vmem:[#allocation8 + $0x148] sm:$0xff] }
 0x33b   :  { %2155 = vtanh.f32 %v3008_v17 }
 0x348   :  { %v2156_v0 = vpop.eup %2155 }
 0x349   :  { %v999_v6 = vmul.f32 %v2156_v0, %v2154_v62  ;;  %v3068_v62 = vld [vmem:[#allocation8 + $0x158] sm:$0xff]  ;;  %v3071_v0 = vld [vmem:[#allocation8 + $0x140] sm:$0xff] }
 0x34b   :  { %1072 = vmatmul.mubr.f32.vlgmr.msra.gmra.mxu0 %v999_v6  ;;  %1143 = vmatmul.mubr.f32.vlgmr.msra.gmra.mxu1 %v999_v6  ;;  %v3074_v6 = vld [vmem:[#allocation8 + $0x150] sm:$0xff] }
 0x34c   :  { %1185 = vmatpush1.msra.mxu0 %v3011_v53  ;;  %1256 = vmatpush1.msra.mxu1 %v3014_v11 }
 0x34d   :  { %1186 = vmatprep.subr.mxu0 %v3017_v10  ;;  %1257 = vmatprep.subr.mxu1 %v3020_v15 }
 0x34e   :  { %1187 = vmatpush1.msra.mxu0 %v3023_v5  ;;  %1258 = vmatpush1.msra.mxu1 %v3026_v8 }
 0x34f   :  { %1188 = vmatprep.subr.mxu0 %v3029_v9  ;;  %1259 = vmatprep.subr.mxu1 %v3032_v13 }
 0x350   :  { %1189 = vmatpush1.msra.mxu0 %v3035_v7  ;;  %1260 = vmatpush1.msra.mxu1 %v3038_v4 }
 0x351   :  { %1190 = vmatprep.subr.mxu0 %v3041_v12  ;;  %1261 = vmatprep.subr.mxu1 %v3044_v19 }
 0x352   :  { %1191 = vmatpush1.msra.mxu0 %v3047_v18  ;;  %1262 = vmatpush1.msra.mxu1 %v3050_v26 }
 0x353   :  { %1192 = vmatprep.subr.mxu0 %v3053_v16  ;;  %1263 = vmatprep.subr.mxu1 %v3056_v42 }
 0x354   :  { %1193 = vmatpush1.msra.mxu0 %v3059_v43  ;;  %1264 = vmatpush1.msra.mxu1 %v3062_v45  ;;  %v3077_v43 = vld [vmem:[#allocation8 + $0x128] sm:$0xff]  ;;  %v3080_v45 = vld [vmem:[#allocation8 + $0x138] sm:$0xff] }
 0x355   :  { %1194 = vmatprep.subr.mxu0 %v3065_v46  ;;  %1265 = vmatprep.subr.mxu1 %v3068_v62 }
 0x356   :  { %1195 = vmatpush1.msra.mxu0 %v3071_v0  ;;  %1266 = vmatpush1.msra.mxu1 %v3074_v6 }
 0x357   :  { %1196 = vmatprep.subr.mxu0 %v3077_v43  ;;  %1267 = vmatprep.subr.mxu1 %v3080_v45 }
 0x358   :  { %1197 = vmatpush1.msra.mxu0 %v2547_v47  ;;  %1268 = vmatpush1.msra.mxu1 %v2549_v48  ;;  %v3644_v48 = vld [vmem:[#allocation45_spill] sm:$0xff] }
 0x359   :  { %1198 = vmatprep.subr.mxu0 %v2553_v49  ;;  %1269 = vmatprep.subr.mxu1 %v2555_v50 }
 0x35a   :  { %1199 = vmatpush1.msra.mxu0 %v2561_v51  ;;  %1270 = vmatpush1.msra.mxu1 %v2563_v52  ;;  %v3645_v52 = vld [vmem:[#allocation47_spill] sm:$0xff] }
 0x35b   :  { %1200 = vmatprep.subr.mxu0 %v2572_v54  ;;  %1271 = vmatprep.subr.mxu1 %v2574_v55 }
 0x35c   :  { %1201 = vmatpush1.msra.mxu0 %v2578_v56  ;;  %1272 = vmatpush1.msra.mxu1 %v2580_v57 }
 0x35d   :  { %1202 = vmatprep.subr.mxu0 %v2584_v58  ;;  %1273 = vmatprep.subr.mxu1 %v2586_v59  ;;  %v3646_v58 = vld [vmem:[#allocation48_spill] sm:$0xff] }
 0x35e   :  { %1203 = vmatpush1.msra.mxu0 %v2592_v60  ;;  %1274 = vmatpush1.msra.mxu1 %v2594_v61  ;;  %v3647_v60 = vld [vmem:[#allocation46_spill] sm:$0xff] }
 0x35f   :  { %1204 = vmatprep.subr.mxu0 %v2603_v63  ;;  %1275 = vmatprep.subr.mxu1 %v2605_v1 }
 0x360   :  { %1205 = vmatpush1.msra.mxu0 %v2609_v2  ;;  %1276 = vmatpush1.msra.mxu1 %v2611_v3 }
 0x361   :  { %1206 = vmatprep.subr.mxu0 %v3591_v35  ;;  %1277 = vmatprep.subr.mxu1 %v3592_v14 }
 0x362   :  { %1207 = vmatpush1.msra.mxu0 %v3593_v44  ;;  %1278 = vmatpush1.msra.mxu1 %v3618_v20 }
 0x363   :  { %1208 = vmatprep.subr.mxu0 %v3619_v21  ;;  %1279 = vmatprep.subr.mxu1 %v3620_v22 }
 0x364   :  { %1209 = vmatpush1.msra.mxu0 %v3621_v23  ;;  %1280 = vmatpush1.msra.mxu1 %v3622_v24 }
 0x365   :  { %1210 = vmatprep.subr.mxu0 %v3623_v25  ;;  %1281 = vmatprep.subr.mxu1 %v3624_v27 }
 0x366   :  { %1211 = vmatpush1.msra.mxu0 %v3625_v28  ;;  %1282 = vmatpush1.msra.mxu1 %v3626_v29 }
 0x367   :  { %1212 = vmatprep.subr.mxu0 %v3627_v30  ;;  %1283 = vmatprep.subr.mxu1 %v3628_v31  ;;  %v3648_v30 = vld [vmem:[#allocation19_spill] sm:$0xff] }
 0x368   :  { %1213 = vmatpush1.msra.mxu0 %v3629_v32  ;;  %1284 = vmatpush1.msra.mxu1 %v3630_v33  ;;  %v3649_v31 = vld [vmem:[#allocation15_spill] sm:$0xff]  ;;  %v3157_v32 = vld [vmem:[#allocation8 + $0x120] sm:$0xff]  ;;  %v3160_v33 = vld [vmem:[#allocation8 + $0x130] sm:$0xff] }
 0x369   :  { %1214 = vmatprep.subr.mxu0 %v3631_v34  ;;  %1285 = vmatprep.subr.mxu1 %v3632_v36  ;;  %v3163_v34 = vld [vmem:[#allocation8 + $0x108] sm:$0xff]  ;;  %v3166_v36 = vld [vmem:[#allocation8 + $0x118] sm:$0xff] }
 0x36a   :  { %1215 = vmatpush1.msra.mxu0 %v3633_v37  ;;  %1248 = vmatprep.mubr.f32.mxu0 %v3634_v38  ;;  %v3169_v37 = vld [vmem:[#allocation8 + $0x100] sm:$0xff] }
 0x36b   :  { %1286 = vmatpush1.msra.mxu1 %v3635_v39  ;;  %1319 = vmatprep.mubr.f32.mxu1 %v3634_v38  ;;  %v3172_v39 = vld [vmem:[#allocation8 + $0x110] sm:$0xff] }
 0x36c   :  { %1361 = vmatprep.subr.mxu0 %v2997_v40  ;;  %1432 = vmatprep.subr.mxu1 %v3000_v41 }
 0x40b   :  { %v1073_v47 = vpop.f32.mrf.mxu0  ;;  %v1144_v55 = vpop.f32.mrf.mxu1 }
 0x40c   :  { %v1149_v49 = vadd.f32 %v1073_v47, %v3644_v48  ;;  %v1151_v61 = vadd.f32 %v1144_v55, %v3647_v60  ;;  %v3178_v47 = vld [vmem:[#allocation8 + $0xf8] sm:$0xff]  ;;  %v3181_v48 = vld [vmem:[#allocation8 + $0xe0] sm:$0xff]  ;;  %v3199_v55 = vld [vmem:[#allocation8 + $0xa8] sm:$0xff] }
 0x40d   :  { %v1075_v50 = vpop.f32.mrf.mxu0  ;;  %v1146_v57 = vpop.f32.mrf.mxu1  ;;  %v3214_v60 = vld [vmem:[#allocation8 + $0x98] sm:$0xff] }
 0x40e   :  { %v2049_v51 = vmul.f32 -1.442695, %v1149_v49  ;;  %v1150_v54 = vadd.f32 %v1075_v50, %v3645_v52  ;;  %v1152_v59 = vadd.f32 %v1146_v57, %v3646_v58  ;;  %v3184_v49 = vld [vmem:[#allocation8 + $0xf0] sm:$0xff]  ;;  %v3187_v50 = vld [vmem:[#allocation8 + $0xc8] sm:$0xff]  ;;  %v3193_v52 = vld [vmem:[#allocation8 + $0xc0] sm:$0xff] }
 0x40f   :  { %v3205_v57 = vld [vmem:[#allocation8 + $0xa0] sm:$0xff]  ;;  %v3208_v58 = vld [vmem:[#allocation8 + $0xb0] sm:$0xff] }
 0x410   :  { %2157 = vpow2.f32 %v2049_v51  ;;  %v2050_v56 = vmul.f32 -1.442695, %v1150_v54  ;;  %v2051_v63 = vmul.f32 -1.442695, %v1152_v59  ;;  %v3190_v51 = vld [vmem:[#allocation8 + $0xd8] sm:$0xff]  ;;  %v3196_v54 = vld [vmem:[#allocation8 + $0xd0] sm:$0xff] }
 0x411   :  { %v3211_v59 = vld [vmem:[#allocation8 + $0x88] sm:$0xff] }
 0x412   :  { %2159 = vpow2.f32 %v2050_v56  ;;  %v3202_v56 = vld [vmem:[#allocation8 + $0xb8] sm:$0xff] }
 0x413   :  { %2161 = vtanh.f32 %v1151_v61  ;;  %v3217_v61 = vld [vmem:[#allocation8 + $0x80] sm:$0xff] }
 0x414   :  { %2163 = vpow2.f32 %v2051_v63  ;;  %v3220_v63 = vld [vmem:[#allocation8 + $0x90] sm:$0xff] }
 0x415   :  { %3650 = vst [vmem:[#allocation16_spill] sm:$0xff] %v3220_v63 }
 0x41d   :  { %v2158_v1 = vpop.eup %2157 }
 0x41e   :  { %v1156_v2 = vadd.f32 1.0, %v2158_v1  ;;  %v3223_v1 = vld [vmem:[#allocation8 + $0x68] sm:$0xff] }
 0x41f   :  { %v2160_v3 = vpop.eup %2159  ;;  %3651 = vst [vmem:[#allocation37_spill] sm:$0xff] %v3223_v1 }
 0x420   :  { %2165 = vrcp.f32 %v1156_v2  ;;  %v1162_v35 = vadd.f32 1.0, %v2160_v3  ;;  %v2162_v14 = vpop.eup %2161  ;;  %v3226_v2 = vld [vmem:[#allocation8 + $0x78] sm:$0xff]  ;;  %v3229_v3 = vld [vmem:[#allocation8 + $0x60] sm:$0xff] }
 0x421   :  { %v2164_v44 = vpop.eup %2163  ;;  %3652 = vst [vmem:[#allocation39_spill] sm:$0xff] %v3226_v2  ;;  %3653 = vst [vmem:[#allocation40_spill] sm:$0xff] %v3229_v3 }
 0x422   :  { %2167 = vrcp.f32 %v1162_v35  ;;  %v1169_v23 = vadd.f32 1.0, %v2164_v44  ;;  %v3232_v35 = vld [vmem:[#allocation8 + $0x70] sm:$0xff]  ;;  %v3238_v44 = vld [vmem:[#allocation8 + $0x58] sm:$0xff] }
 0x423   :  { %3654 = vst [vmem:[#allocation38_spill] sm:$0xff] %v3232_v35  ;;  %3656 = vst [vmem:[#allocation21_spill] sm:$0xff] %v3238_v44 }
 0x424   :  { %2169 = vrcp.f32 %v1169_v23  ;;  %v3250_v23 = vld [vmem:[#allocation8 + $0x38] sm:$0xff] }
 0x425   :  { %3660 = vst [vmem:[#allocation25_spill] sm:$0xff] %v3250_v23 }
 0x42d   :  { %v2166_v20 = vpop.eup %2165 }
 0x42e   :  { %v1173_v21 = vmul.f32 %v2166_v20, %v2162_v14  ;;  %v3235_v14 = vld [vmem:[#allocation8 + $0x48] sm:$0xff]  ;;  %v3241_v20 = vld [vmem:[#allocation8 + $0x40] sm:$0xff] }
 0x42f   :  { %v2168_v22 = vpop.eup %2167  ;;  %3655 = vst [vmem:[#allocation20_spill] sm:$0xff] %v3235_v14  ;;  %3657 = vst [vmem:[#allocation22_spill] sm:$0xff] %v3241_v20 }
 0x430   :  { %v1172_v24 = vmul.f32 %v2168_v22, %v3008_v17  ;;  %v3175_v17 = vld [vmem:[#allocation8 + $0xe8] sm:$0xff] }
 0x431   :  { %v2170_v27 = vpop.eup %2169  ;;  %v3247_v22 = vld [vmem:[#allocation8 + $0x28] sm:$0xff] }
 0x432   :  { %v3130_v25 = vadd.f32 %v1173_v21, %v1172_v24  ;;  %v3244_v21 = vld [vmem:[#allocation8 + $0x50] sm:$0xff]  ;;  %3659 = vst [vmem:[#allocation24_spill] sm:$0xff] %v3247_v22  ;;  %v3253_v24 = vld [vmem:[#allocation8 + $0x20] sm:$0xff] }
 0x433   :  { %3658 = vst [vmem:[#allocation23_spill] sm:$0xff] %v3244_v21  ;;  %3661 = vst [vmem:[#allocation26_spill] sm:$0xff] %v3253_v24 }
 0x434   :  { %2171 = vtanh.f32 %v3130_v25 }
 0x441   :  { %v2172_v28 = vpop.eup %2171 }
 0x442   :  { %v1176_v29 = vmul.f32 %v2172_v28, %v2170_v27  ;;  %v3256_v27 = vld [vmem:[#allocation8 + $0x30] sm:$0xff]  ;;  %v3259_v28 = vld [vmem:[#allocation8 + $0x8] sm:$0xff] }
 0x443   :  { %3662 = vst [vmem:[#allocation27_spill] sm:$0xff] %v3256_v27  ;;  %3663 = vst [vmem:[#allocation28_spill] sm:$0xff] %v3259_v28 }
 0x444   :  { %1249 = vmatmul.mubr.f32.vlgmr.msra.gmra.mxu0 %v1176_v29  ;;  %1320 = vmatmul.mubr.f32.vlgmr.msra.gmra.mxu1 %v1176_v29  ;;  %v3262_v29 = vld [vmem:[#allocation8 + $0x18] sm:$0xff] }
 0x445   :  { %1362 = vmatpush1.msra.mxu0 %v3011_v53  ;;  %1433 = vmatpush1.msra.mxu1 %v3014_v11  ;;  %3664 = vst [vmem:[#allocation29_spill] sm:$0xff] %v3262_v29 }
 0x446   :  { %1363 = vmatprep.subr.mxu0 %v3017_v10  ;;  %1434 = vmatprep.subr.mxu1 %v3020_v15 }
 0x447   :  { %1364 = vmatpush1.msra.mxu0 %v3023_v5  ;;  %1435 = vmatpush1.msra.mxu1 %v3026_v8 }
 0x448   :  { %1365 = vmatprep.subr.mxu0 %v3029_v9  ;;  %1436 = vmatprep.subr.mxu1 %v3032_v13 }
 0x449   :  { %1366 = vmatpush1.msra.mxu0 %v3035_v7  ;;  %1437 = vmatpush1.msra.mxu1 %v3038_v4 }
 0x44a   :  { %1367 = vmatprep.subr.mxu0 %v3041_v12  ;;  %1438 = vmatprep.subr.mxu1 %v3044_v19 }
 0x44b   :  { %1368 = vmatpush1.msra.mxu0 %v3047_v18  ;;  %1439 = vmatpush1.msra.mxu1 %v3050_v26 }
 0x44c   :  { %1369 = vmatprep.subr.mxu0 %v3053_v16  ;;  %1440 = vmatprep.subr.mxu1 %v3056_v42 }
 0x44d   :  { %1370 = vmatpush1.msra.mxu0 %v3648_v30  ;;  %1441 = vmatpush1.msra.mxu1 %v3649_v31 }
 0x44e   :  { %1371 = vmatprep.subr.mxu0 %v3065_v46  ;;  %1442 = vmatprep.subr.mxu1 %v3068_v62 }
 0x44f   :  { %1372 = vmatpush1.msra.mxu0 %v3071_v0  ;;  %1443 = vmatpush1.msra.mxu1 %v3074_v6 }
 0x450   :  { %1373 = vmatprep.subr.mxu0 %v3077_v43  ;;  %1444 = vmatprep.subr.mxu1 %v3080_v45 }
 0x451   :  { %1374 = vmatpush1.msra.mxu0 %v3157_v32  ;;  %1445 = vmatpush1.msra.mxu1 %v3160_v33 }
 0x452   :  { %1375 = vmatprep.subr.mxu0 %v3163_v34  ;;  %1446 = vmatprep.subr.mxu1 %v3166_v36 }
 0x453   :  { %1376 = vmatpush1.msra.mxu0 %v3169_v37  ;;  %1447 = vmatpush1.msra.mxu1 %v3172_v39 }
 0x454   :  { %1377 = vmatprep.subr.mxu0 %v3175_v17  ;;  %1448 = vmatprep.subr.mxu1 %v3178_v47 }
 0x455   :  { %1378 = vmatpush1.msra.mxu0 %v3181_v48  ;;  %1449 = vmatpush1.msra.mxu1 %v3184_v49 }
 0x456   :  { %1379 = vmatprep.subr.mxu0 %v3187_v50  ;;  %1450 = vmatprep.subr.mxu1 %v3190_v51 }
 0x457   :  { %1380 = vmatpush1.msra.mxu0 %v3193_v52  ;;  %1451 = vmatpush1.msra.mxu1 %v3196_v54 }
 0x458   :  { %1381 = vmatprep.subr.mxu0 %v3199_v55  ;;  %1452 = vmatprep.subr.mxu1 %v3202_v56 }
 0x459   :  { %1382 = vmatpush1.msra.mxu0 %v3205_v57  ;;  %1453 = vmatpush1.msra.mxu1 %v3208_v58 }
 0x45a   :  { %1383 = vmatprep.subr.mxu0 %v3211_v59  ;;  %1454 = vmatprep.subr.mxu1 %v3214_v60 }
 0x45b   :  { %1384 = vmatpush1.msra.mxu0 %v3217_v61  ;;  %1455 = vmatpush1.msra.mxu1 %v3220_v63 }
 0x45c   :  { %1385 = vmatprep.subr.mxu0 %v3223_v1  ;;  %1456 = vmatprep.subr.mxu1 %v3226_v2  ;;  %v3670_v2 = vld [vmem:[#allocation50_spill] sm:$0xff] }
 0x45d   :  { %1386 = vmatpush1.msra.mxu0 %v3229_v3  ;;  %1457 = vmatpush1.msra.mxu1 %v3232_v35  ;;  %v3669_v3 = vld [vmem:[#allocation52_spill] sm:$0xff] }
 0x45e   :  { %1387 = vmatprep.subr.mxu0 %v3235_v14  ;;  %1458 = vmatprep.subr.mxu1 %v3238_v44 }
 0x45f   :  { %1388 = vmatpush1.msra.mxu0 %v3241_v20  ;;  %1459 = vmatpush1.msra.mxu1 %v3244_v21  ;;  %v3668_v20 = vld [vmem:[#allocation51_spill] sm:$0xff] }
 0x460   :  { %1389 = vmatprep.subr.mxu0 %v3247_v22  ;;  %1460 = vmatprep.subr.mxu1 %v3250_v23  ;;  %v3265_v22 = vld [vmem:[#allocation8] sm:$0xff]  ;;  %v3269_v23 = vld [vmem:[#allocation8 + $0x10] sm:$0xff] }
 0x461   :  { %1390 = vmatpush1.msra.mxu0 %v3253_v24  ;;  %1461 = vmatpush1.msra.mxu1 %v3256_v27  ;;  %3665 = vst [vmem:[#allocation30_spill] sm:$0xff] %v3265_v22  ;;  %3666 = vst [vmem:[#allocation31_spill] sm:$0xff] %v3269_v23  ;;  %v3667_v27 = vld [vmem:[#allocation49_spill] sm:$0xff] }
 0x462   :  { %1391 = vmatprep.subr.mxu0 %v3259_v28  ;;  %1462 = vmatprep.subr.mxu1 %v3262_v29 }
 0x463   :  { %1392 = vmatpush1.msra.mxu0 %v3265_v22  ;;  %1425 = vmatprep.mubr.f32.mxu0 %v3634_v38 }
 0x464   :  { %1463 = vmatpush1.msra.mxu1 %v3269_v23  ;;  %1496 = vmatprep.mubr.f32.mxu1 %v3634_v38 }
 0x465   :  { %1538 = vmatprep.subr.mxu0 %v2997_v40  ;;  %1609 = vmatprep.subr.mxu1 %v3000_v41 }
 0x504   :  { %v1250_v28 = vpop.f32.mrf.mxu0  ;;  %v1321_v22 = vpop.f32.mrf.mxu1 }
 0x505   :  { %v1326_v24 = vadd.f32 %v1250_v28, %v3667_v27  ;;  %v1328_v38 = vadd.f32 %v1321_v22, %v3670_v2  ;;  %v3676_v22 = vld [vmem:[#allocation20_spill] sm:$0xff] }
 0x506   :  { %v1252_v29 = vpop.f32.mrf.mxu0  ;;  %v1323_v35 = vpop.f32.mrf.mxu1 }
 0x507   :  { %v2052_v21 = vmul.f32 -1.442695, %v1326_v24  ;;  %v1327_v44 = vadd.f32 %v1252_v29, %v3668_v20  ;;  %v1329_v23 = vadd.f32 %v1323_v35, %v3669_v3  ;;  %v3675_v35 = vld [vmem:[#allocation38_spill] sm:$0xff] }
 0x509   :  { %2173 = vpow2.f32 %v2052_v21  ;;  %v2053_v14 = vmul.f32 -1.442695, %v1327_v44  ;;  %v2054_v1 = vmul.f32 -1.442695, %v1329_v23  ;;  %v3677_v23 = vld [vmem:[#allocation21_spill] sm:$0xff] }
 0x50b   :  { %2175 = vpow2.f32 %v2053_v14 }
 0x50c   :  { %2177 = vtanh.f32 %v1328_v38 }
 0x50d   :  { %2179 = vpow2.f32 %v2054_v1  ;;  %v3674_v1 = vld [vmem:[#allocation40_spill] sm:$0xff] }
 0x516   :  { %v2174_v40 = vpop.eup %2173 }
 0x517   :  { %v1333_v63 = vadd.f32 1.0, %v2174_v40 }
 0x518   :  { %v2176_v41 = vpop.eup %2175 }
 0x519   :  { %2181 = vrcp.f32 %v1333_v63  ;;  %v1339_v27 = vadd.f32 1.0, %v2176_v41  ;;  %v2178_v24 = vpop.eup %2177  ;;  %v3671_v41 = vld [vmem:[#allocation16_spill] sm:$0xff]  ;;  %v3673_v63 = vld [vmem:[#allocation39_spill] sm:$0xff] }
 0x51a   :  { %v2180_v20 = vpop.eup %2179 }
 0x51b   :  { %2183 = vrcp.f32 %v1339_v27  ;;  %v1346_v14 = vadd.f32 1.0, %v2180_v20  ;;  %v3678_v27 = vld [vmem:[#allocation22_spill] sm:$0xff]  ;;  %v3680_v20 = vld [vmem:[#allocation24_spill] sm:$0xff] }
 0x51d   :  { %2185 = vrcp.f32 %v1346_v14  ;;  %v3684_v14 = vld [vmem:[#allocation28_spill] sm:$0xff] }
 0x526   :  { %v2182_v21 = vpop.eup %2181 }
 0x527   :  { %v1350_v28 = vmul.f32 %v2182_v21, %v2178_v24  ;;  %v3679_v24 = vld [vmem:[#allocation23_spill] sm:$0xff]  ;;  %v3681_v21 = vld [vmem:[#allocation25_spill] sm:$0xff] }
 0x528   :  { %v2184_v44 = vpop.eup %2183 }
 0x529   :  { %v1349_v29 = vmul.f32 %v2184_v44, %v3130_v25  ;;  %v3672_v25 = vld [vmem:[#allocation37_spill] sm:$0xff]  ;;  %v3683_v44 = vld [vmem:[#allocation27_spill] sm:$0xff] }
 0x52a   :  { %v2186_v40 = vpop.eup %2185 }
 0x52b   :  { %v3280_v3 = vadd.f32 %v1350_v28, %v1349_v29  ;;  %v3682_v28 = vld [vmem:[#allocation26_spill] sm:$0xff]  ;;  %v3685_v29 = vld [vmem:[#allocation29_spill] sm:$0xff] }
 0x52d   :  { %2187 = vtanh.f32 %v3280_v3 }
 0x53a   :  { %v2188_v38 = vpop.eup %2187 }
 0x53b   :  { %v1353_v2 = vmul.f32 %v2188_v38, %v2186_v40  ;;  %v3686_v40 = vld [vmem:[#allocation30_spill] sm:$0xff]  ;;  %v3687_v38 = vmov 0.0  }
 0x53d   :  { %1426 = vmatmul.mubr.f32.vlgmr.msra.gmra.mxu0 %v1353_v2  ;;  %1497 = vmatmul.mubr.f32.vlgmr.msra.gmra.mxu1 %v1353_v2  ;;  %v3688_v2 = vld [vmem:[#allocation31_spill] sm:$0xff] }
 0x53e   :  { %1539 = vmatpush1.msra.mxu0 %v3011_v53  ;;  %1610 = vmatpush1.msra.mxu1 %v3014_v11 }
 0x53f   :  { %1540 = vmatprep.subr.mxu0 %v3017_v10  ;;  %1611 = vmatprep.subr.mxu1 %v3020_v15 }
 0x540   :  { %1541 = vmatpush1.msra.mxu0 %v3023_v5  ;;  %1612 = vmatpush1.msra.mxu1 %v3026_v8 }
 0x541   :  { %1542 = vmatprep.subr.mxu0 %v3029_v9  ;;  %1613 = vmatprep.subr.mxu1 %v3032_v13 }
 0x542   :  { %1543 = vmatpush1.msra.mxu0 %v3035_v7  ;;  %1614 = vmatpush1.msra.mxu1 %v3038_v4 }
 0x543   :  { %1544 = vmatprep.subr.mxu0 %v3041_v12  ;;  %1615 = vmatprep.subr.mxu1 %v3044_v19 }
 0x544   :  { %1545 = vmatpush1.msra.mxu0 %v3047_v18  ;;  %1616 = vmatpush1.msra.mxu1 %v3050_v26 }
 0x545   :  { %1546 = vmatprep.subr.mxu0 %v3053_v16  ;;  %1617 = vmatprep.subr.mxu1 %v3056_v42 }
 0x546   :  { %1547 = vmatpush1.msra.mxu0 %v3648_v30  ;;  %1618 = vmatpush1.msra.mxu1 %v3649_v31 }
 0x547   :  { %1548 = vmatprep.subr.mxu0 %v3065_v46  ;;  %1619 = vmatprep.subr.mxu1 %v3068_v62 }
 0x548   :  { %1549 = vmatpush1.msra.mxu0 %v3071_v0  ;;  %1620 = vmatpush1.msra.mxu1 %v3074_v6 }
 0x549   :  { %1550 = vmatprep.subr.mxu0 %v3077_v43  ;;  %1621 = vmatprep.subr.mxu1 %v3080_v45 }
 0x54a   :  { %1551 = vmatpush1.msra.mxu0 %v3157_v32  ;;  %1622 = vmatpush1.msra.mxu1 %v3160_v33 }
 0x54b   :  { %1552 = vmatprep.subr.mxu0 %v3163_v34  ;;  %1623 = vmatprep.subr.mxu1 %v3166_v36 }
 0x54c   :  { %1553 = vmatpush1.msra.mxu0 %v3169_v37  ;;  %1624 = vmatpush1.msra.mxu1 %v3172_v39 }
 0x54d   :  { %1554 = vmatprep.subr.mxu0 %v3175_v17  ;;  %1625 = vmatprep.subr.mxu1 %v3178_v47 }
 0x54e   :  { %1555 = vmatpush1.msra.mxu0 %v3181_v48  ;;  %1626 = vmatpush1.msra.mxu1 %v3184_v49 }
 0x54f   :  { %1556 = vmatprep.subr.mxu0 %v3187_v50  ;;  %1627 = vmatprep.subr.mxu1 %v3190_v51 }
 0x550   :  { %1557 = vmatpush1.msra.mxu0 %v3193_v52  ;;  %1628 = vmatpush1.msra.mxu1 %v3196_v54 }
 0x551   :  { %1558 = vmatprep.subr.mxu0 %v3199_v55  ;;  %1629 = vmatprep.subr.mxu1 %v3202_v56 }
 0x552   :  { %1559 = vmatpush1.msra.mxu0 %v3205_v57  ;;  %1630 = vmatpush1.msra.mxu1 %v3208_v58 }
 0x553   :  { %1560 = vmatprep.subr.mxu0 %v3211_v59  ;;  %1631 = vmatprep.subr.mxu1 %v3214_v60 }
 0x554   :  { %1561 = vmatpush1.msra.mxu0 %v3217_v61  ;;  %1632 = vmatpush1.msra.mxu1 %v3671_v41 }
 0x555   :  { %1562 = vmatprep.subr.mxu0 %v3672_v25  ;;  %1633 = vmatprep.subr.mxu1 %v3673_v63  ;;  %v3694_v63 = vld [vmem:[#allocation54_spill] sm:$0xff] }
 0x556   :  { %1563 = vmatpush1.msra.mxu0 %v3674_v1  ;;  %1634 = vmatpush1.msra.mxu1 %v3675_v35  ;;  %v3693_v1 = vld [vmem:[#allocation56_spill] sm:$0xff] }
 0x557   :  { %1564 = vmatprep.subr.mxu0 %v3676_v22  ;;  %1635 = vmatprep.subr.mxu1 %v3677_v23 }
 0x558   :  { %1565 = vmatpush1.msra.mxu0 %v3678_v27  ;;  %1636 = vmatpush1.msra.mxu1 %v3679_v24  ;;  %v3689_v24 = vld [vmem:[#allocation17_spill] sm:$0xff] }
 0x559   :  { %1566 = vmatprep.subr.mxu0 %v3680_v20  ;;  %1637 = vmatprep.subr.mxu1 %v3681_v21  ;;  %v3690_v20 = vld [vmem:[#allocation18_spill] sm:$0xff] }
 0x55a   :  { %1567 = vmatpush1.msra.mxu0 %v3682_v28  ;;  %1638 = vmatpush1.msra.mxu1 %v3683_v44  ;;  %v3691_v28 = vld [vmem:[#allocation53_spill] sm:$0xff] }
 0x55b   :  { %1568 = vmatprep.subr.mxu0 %v3684_v14  ;;  %1639 = vmatprep.subr.mxu1 %v3685_v29  ;;  %v3692_v14 = vld [vmem:[#allocation55_spill] sm:$0xff] }
 0x55c   :  { %1569 = vmatpush1.msra.mxu0 %v3686_v40  ;;  %1602 = vmatprep.mubr.f32.mxu0 %v3687_v38 }
 0x55d   :  { %1640 = vmatpush1.msra.mxu1 %v3688_v2  ;;  %1673 = vmatprep.mubr.f32.mxu1 %v3687_v38 }
 0x55e   :  { %1715 = vmatprep.subr.mxu0 %v3689_v24  ;;  %1786 = vmatprep.subr.mxu1 %v3690_v20 }
 0x5fd   :  { %v1427_v21 = vpop.f32.mrf.mxu0  ;;  %v1498_v29 = vpop.f32.mrf.mxu1 }
 0x5fe   :  { %v1503_v27 = vadd.f32 %v1427_v21, %v3691_v28  ;;  %v1505_v38 = vadd.f32 %v1498_v29, %v3694_v63 }
 0x5ff   :  { %v1429_v44 = vpop.f32.mrf.mxu0  ;;  %v1500_v35 = vpop.f32.mrf.mxu1 }
 0x600   :  { %v2055_v23 = vmul.f32 -1.442695, %v1503_v27  ;;  %v1504_v22 = vadd.f32 %v1429_v44, %v3692_v14  ;;  %v1506_v2 = vadd.f32 %v1500_v35, %v3693_v1 }
 0x602   :  { %2189 = vpow2.f32 %v2055_v23  ;;  %v2056_v40 = vmul.f32 -1.442695, %v1504_v22  ;;  %v2057_v25 = vmul.f32 -1.442695, %v1506_v2  ;;  %v1906_v2 = vld [vmem:[#allocation10 + $0x78] sm:$0xff] }
 0x604   :  { %2191 = vpow2.f32 %v2056_v40 }
 0x605   :  { %2193 = vtanh.f32 %v1505_v38  ;;  %v1922_v38 = vld [vmem:[#allocation10 + $0xf8] sm:$0xff] }
 0x606   :  { %2195 = vpow2.f32 %v2057_v25 }
 0x60f   :  { %v2190_v24 = vpop.eup %2189 }
 0x610   :  { %v1510_v41 = vadd.f32 1.0, %v2190_v24  ;;  %v1921_v24 = vld [vmem:[#allocation10 + $0xf0] sm:$0xff] }
 0x611   :  { %v2192_v20 = vpop.eup %2191 }
 0x612   :  { %2197 = vrcp.f32 %v1510_v41  ;;  %v1516_v21 = vadd.f32 1.0, %v2192_v20  ;;  %v2194_v27 = vpop.eup %2193  ;;  %v1905_v20 = vld [vmem:[#allocation10 + $0x70] sm:$0xff] }
 0x613   :  { %v2196_v28 = vpop.eup %2195 }
 0x614   :  { %2199 = vrcp.f32 %v1516_v21  ;;  %v1523_v14 = vadd.f32 1.0, %v2196_v28  ;;  %v1920_v21 = vld [vmem:[#allocation10 + $0xe8] sm:$0xff]  ;;  %v1919_v28 = vld [vmem:[#allocation10 + $0xe0] sm:$0xff] }
 0x616   :  { %2201 = vrcp.f32 %v1523_v14  ;;  %v1917_v14 = vld [vmem:[#allocation10 + $0xd0] sm:$0xff] }
 0x61f   :  { %v2198_v23 = vpop.eup %2197 }
 0x620   :  { %v1527_v44 = vmul.f32 %v2198_v23, %v2194_v27  ;;  %v1904_v27 = vld [vmem:[#allocation10 + $0x68] sm:$0xff]  ;;  %v1903_v23 = vld [vmem:[#allocation10 + $0x60] sm:$0xff] }
 0x621   :  { %v2200_v22 = vpop.eup %2199 }
 0x622   :  { %v1526_v40 = vmul.f32 %v2200_v22, %v3280_v3  ;;  %v1902_v22 = vld [vmem:[#allocation10 + $0x58] sm:$0xff] }
 0x623   :  { %v2202_v63 = vpop.eup %2201 }
 0x624   :  { %v3354_v1 = vadd.f32 %v1527_v44, %v1526_v40  ;;  %v1918_v44 = vld [vmem:[#allocation10 + $0xd8] sm:$0xff]  ;;  %v1901_v40 = vld [vmem:[#allocation10 + $0x50] sm:$0xff] }
 0x626   :  { %2203 = vtanh.f32 %v3354_v1 }
 0x633   :  { %v2204_v35 = vpop.eup %2203 }
 0x634   :  { %v1530_v29 = vmul.f32 %v2204_v35, %v2202_v63  ;;  %v1900_v63 = vld [vmem:[#allocation10 + $0x48] sm:$0xff]  ;;  %v1915_v35 = vld [vmem:[#allocation10 + $0xc0] sm:$0xff] }
 0x636   :  { %1603 = vmatmul.mubr.f32.vlgmr.msra.gmra.mxu0 %v1530_v29  ;;  %1674 = vmatmul.mubr.f32.vlgmr.msra.gmra.mxu1 %v1530_v29  ;;  %v1899_v29 = vld [vmem:[#allocation10 + $0x40] sm:$0xff] }
 0x637   :  { %1716 = vmatpush1.msra.mxu0 %v3011_v53  ;;  %1787 = vmatpush1.msra.mxu1 %v3014_v11  ;;  %v3695_v53 = vld [vmem:[#allocation16_spill] sm:$0xff]  ;;  %v3696_v11 = vld [vmem:[#allocation37_spill] sm:$0xff] }
 0x638   :  { %1717 = vmatprep.subr.mxu0 %v3017_v10  ;;  %1788 = vmatprep.subr.mxu1 %v3020_v15  ;;  %v3697_v10 = vld [vmem:[#allocation39_spill] sm:$0xff]  ;;  %v3698_v15 = vld [vmem:[#allocation40_spill] sm:$0xff] }
 0x639   :  { %1718 = vmatpush1.msra.mxu0 %v3023_v5  ;;  %1789 = vmatpush1.msra.mxu1 %v3026_v8  ;;  %v3699_v5 = vld [vmem:[#allocation38_spill] sm:$0xff]  ;;  %v3700_v8 = vld [vmem:[#allocation20_spill] sm:$0xff] }
 0x63a   :  { %1719 = vmatprep.subr.mxu0 %v3029_v9  ;;  %1790 = vmatprep.subr.mxu1 %v3032_v13  ;;  %v3701_v9 = vld [vmem:[#allocation21_spill] sm:$0xff]  ;;  %v3702_v13 = vld [vmem:[#allocation22_spill] sm:$0xff] }
 0x63b   :  { %1720 = vmatpush1.msra.mxu0 %v3035_v7  ;;  %1791 = vmatpush1.msra.mxu1 %v3038_v4  ;;  %v3703_v7 = vld [vmem:[#allocation23_spill] sm:$0xff]  ;;  %v3704_v4 = vld [vmem:[#allocation24_spill] sm:$0xff] }
 0x63c   :  { %1721 = vmatprep.subr.mxu0 %v3041_v12  ;;  %1792 = vmatprep.subr.mxu1 %v3044_v19  ;;  %v3705_v12 = vld [vmem:[#allocation25_spill] sm:$0xff]  ;;  %v3706_v19 = vld [vmem:[#allocation26_spill] sm:$0xff] }
 0x63d   :  { %1722 = vmatpush1.msra.mxu0 %v3047_v18  ;;  %1793 = vmatpush1.msra.mxu1 %v3050_v26  ;;  %v3707_v18 = vld [vmem:[#allocation27_spill] sm:$0xff]  ;;  %v3708_v26 = vld [vmem:[#allocation28_spill] sm:$0xff] }
 0x63e   :  { %1723 = vmatprep.subr.mxu0 %v3053_v16  ;;  %1794 = vmatprep.subr.mxu1 %v3056_v42  ;;  %v3709_v16 = vld [vmem:[#allocation29_spill] sm:$0xff]  ;;  %v3710_v42 = vld [vmem:[#allocation30_spill] sm:$0xff] }
 0x63f   :  { %1724 = vmatpush1.msra.mxu0 %v3648_v30  ;;  %1795 = vmatpush1.msra.mxu1 %v3649_v31  ;;  %v3714_v31 = vld [vmem:[#allocation59_spill] sm:$0xff] }
 0x640   :  { %1725 = vmatprep.subr.mxu0 %v3065_v46  ;;  %1796 = vmatprep.subr.mxu1 %v3068_v62  ;;  %v3713_v62 = vld [vmem:[#allocation57_spill] sm:$0xff] }
 0x641   :  { %1726 = vmatpush1.msra.mxu0 %v3071_v0  ;;  %1797 = vmatpush1.msra.mxu1 %v3074_v6 }
 0x642   :  { %1727 = vmatprep.subr.mxu0 %v3077_v43  ;;  %1798 = vmatprep.subr.mxu1 %v3080_v45  ;;  %v3711_v43 = vmov 0.0   ;;  %v3712_v45 = vld [vmem:[#allocation31_spill] sm:$0xff] }
 0x643   :  { %1728 = vmatpush1.msra.mxu0 %v3157_v32  ;;  %1799 = vmatpush1.msra.mxu1 %v3160_v33 }
 0x644   :  { %1729 = vmatprep.subr.mxu0 %v3163_v34  ;;  %1800 = vmatprep.subr.mxu1 %v3166_v36 }
 0x645   :  { %1730 = vmatpush1.msra.mxu0 %v3169_v37  ;;  %1801 = vmatpush1.msra.mxu1 %v3172_v39  ;;  %v3715_v37 = vld [vmem:[#allocation60_spill] sm:$0xff] }
 0x646   :  { %1731 = vmatprep.subr.mxu0 %v3175_v17  ;;  %1802 = vmatprep.subr.mxu1 %v3178_v47  ;;  %v3716_v17 = vld [vmem:[#allocation58_spill] sm:$0xff] }
 0x647   :  { %1732 = vmatpush1.msra.mxu0 %v3181_v48  ;;  %1803 = vmatpush1.msra.mxu1 %v3184_v49 }
 0x648   :  { %1733 = vmatprep.subr.mxu0 %v3187_v50  ;;  %1804 = vmatprep.subr.mxu1 %v3190_v51 }
 0x649   :  { %1734 = vmatpush1.msra.mxu0 %v3193_v52  ;;  %1805 = vmatpush1.msra.mxu1 %v3196_v54 }
 0x64a   :  { %1735 = vmatprep.subr.mxu0 %v3199_v55  ;;  %1806 = vmatprep.subr.mxu1 %v3202_v56 }
 0x64b   :  { %1736 = vmatpush1.msra.mxu0 %v3205_v57  ;;  %1807 = vmatpush1.msra.mxu1 %v3208_v58 }
 0x64c   :  { %1737 = vmatprep.subr.mxu0 %v3211_v59  ;;  %1808 = vmatprep.subr.mxu1 %v3214_v60 }
 0x64d   :  { %1738 = vmatpush1.msra.mxu0 %v3217_v61  ;;  %1809 = vmatpush1.msra.mxu1 %v3695_v53  ;;  %v1914_v53 = vld [vmem:[#allocation10 + $0xb8] sm:$0xff] }
 0x64e   :  { %1739 = vmatprep.subr.mxu0 %v3696_v11  ;;  %1810 = vmatprep.subr.mxu1 %v3697_v10  ;;  %v1898_v11 = vld [vmem:[#allocation10 + $0x38] sm:$0xff]  ;;  %v1913_v10 = vld [vmem:[#allocation10 + $0xb0] sm:$0xff] }
 0x64f   :  { %1740 = vmatpush1.msra.mxu0 %v3698_v15  ;;  %1811 = vmatpush1.msra.mxu1 %v3699_v5  ;;  %v1897_v15 = vld [vmem:[#allocation10 + $0x30] sm:$0xff]  ;;  %v1912_v5 = vld [vmem:[#allocation10 + $0xa8] sm:$0xff] }
 0x650   :  { %1741 = vmatprep.subr.mxu0 %v3700_v8  ;;  %1812 = vmatprep.subr.mxu1 %v3701_v9  ;;  %v1896_v8 = vld [vmem:[#allocation10 + $0x28] sm:$0xff]  ;;  %v1911_v9 = vld [vmem:[#allocation10 + $0xa0] sm:$0xff] }
 0x651   :  { %1742 = vmatpush1.msra.mxu0 %v3702_v13  ;;  %1813 = vmatpush1.msra.mxu1 %v3703_v7  ;;  %v1890_v13 = vld [vmem:[%s3444_s1] sm:$0xff] }
 0x652   :  { %1743 = vmatprep.subr.mxu0 %v3704_v4  ;;  %1814 = vmatprep.subr.mxu1 %v3705_v12  ;;  %v1895_v7 = vld [vmem:[#allocation10 + $0x20] sm:$0xff]  ;;  %v1910_v4 = vld [vmem:[#allocation10 + $0x98] sm:$0xff] }
 0x653   :  { %1744 = vmatpush1.msra.mxu0 %v3706_v19  ;;  %1815 = vmatpush1.msra.mxu1 %v3707_v18  ;;  %v1894_v12 = vld [vmem:[#allocation10 + $0x18] sm:$0xff]  ;;  %v1909_v19 = vld [vmem:[#allocation10 + $0x90] sm:$0xff] }
 0x654   :  { %1745 = vmatprep.subr.mxu0 %v3708_v26  ;;  %1816 = vmatprep.subr.mxu1 %v3709_v16  ;;  %v1893_v18 = vld [vmem:[#allocation10 + $0x10] sm:$0xff]  ;;  %v1908_v26 = vld [vmem:[#allocation10 + $0x88] sm:$0xff] }
 0x655   :  { %1746 = vmatpush1.msra.mxu0 %v3710_v42  ;;  %1779 = vmatprep.mubr.f32.mxu0 %v3711_v43  ;;  %v1892_v16 = vld [vmem:[#allocation10 + $0x8] sm:$0xff]  ;;  %v1907_v42 = vld [vmem:[#allocation10 + $0x80] sm:$0xff] }
 0x656   :  { %1817 = vmatpush1.msra.mxu1 %v3712_v45  ;;  %1850 = vmatprep.mubr.f32.mxu1 %v3711_v43  ;;  %v1891_v43 = vld [vmem:[#allocation10] sm:$0xff] }
 0x657   :  { %2065 = vmatprep.subr.mxu0 %v1922_v38 }
 0x6f6   :  { %v1604_v46 = vpop.f32.mrf.mxu0  ;;  %v1675_v33 = vpop.f32.mrf.mxu1 }
 0x6f7   :  { %v1680_v0 = vadd.f32 %v1604_v46, %v3713_v62  ;;  %v1682_v47 = vadd.f32 %v1675_v33, %v3716_v17  ;;  %v3717_v46 = vld [vmem:[#allocation61_spill] sm:$0xff] }
 0x6f8   :  { %v1606_v6 = vpop.f32.mrf.mxu0  ;;  %v1677_v36 = vpop.f32.mrf.mxu1 }
 0x6f9   :  { %v2058_v30 = vmul.f32 -1.442695, %v1680_v0  ;;  %v1681_v32 = vadd.f32 %v1606_v6, %v3714_v31  ;;  %v1683_v39 = vadd.f32 %v1677_v36, %v3715_v37  ;;  %v3719_v36 = vld [vmem:[#allocation64_spill] sm:$0xff] }
 0x6fb   :  { %2205 = vpow2.f32 %v2058_v30  ;;  %v2059_v34 = vmul.f32 -1.442695, %v1681_v32  ;;  %v2060_v48 = vmul.f32 -1.442695, %v1683_v39  ;;  %v3718_v30 = vld [vmem:[#allocation63_spill] sm:$0xff]  ;;  %v3720_v39 = vld [vmem:[#allocation62_spill] sm:$0xff] }
 0x6fd   :  { %2207 = vpow2.f32 %v2059_v34 }
 0x6fe   :  { %2209 = vtanh.f32 %v1682_v47 }
 0x6ff   :  { %2211 = vpow2.f32 %v2060_v48 }
 0x708   :  { %v2206_v49 = vpop.eup %2205 }
 0x709   :  { %v1687_v50 = vadd.f32 1.0, %v2206_v49 }
 0x70a   :  { %v2208_v51 = vpop.eup %2207 }
 0x70b   :  { %2213 = vrcp.f32 %v1687_v50  ;;  %v1693_v52 = vadd.f32 1.0, %v2208_v51  ;;  %v2210_v54 = vpop.eup %2209 }
 0x70c   :  { %v2212_v55 = vpop.eup %2211 }
 0x70d   :  { %2215 = vrcp.f32 %v1693_v52  ;;  %v1700_v59 = vadd.f32 1.0, %v2212_v55 }
 0x70f   :  { %2217 = vrcp.f32 %v1700_v59 }
 0x718   :  { %v2214_v56 = vpop.eup %2213 }
 0x719   :  { %v1704_v57 = vmul.f32 %v2214_v56, %v2210_v54 }
 0x71a   :  { %v2216_v58 = vpop.eup %2215 }
 0x71b   :  { %v1703_v60 = vmul.f32 %v2216_v58, %v3354_v1  ;;  %v1916_v1 = vld [vmem:[#allocation10 + $0xc8] sm:$0xff] }
 0x71c   :  { %v2218_v3 = vpop.eup %2217 }
 0x71d   :  { %v3426_v61 = vadd.f32 %v1704_v57, %v1703_v60 }
 0x71f   :  { %2219 = vtanh.f32 %v3426_v61 }
 0x72c   :  { %v2220_v41 = vpop.eup %2219 }
 0x72d   :  { %v1707_v25 = vmul.f32 %v2220_v41, %v2218_v3 }
 0x72f   :  { %1780 = vmatmul.mubr.f32.vlgmr.msra.gmra.mxu0 %v1707_v25  ;;  %1851 = vmatmul.mubr.f32.vlgmr.msra.gmra.mxu1 %v1707_v25 }
 0x730   :  { %2066 = vmatpush3.msra.mxu0 %v1906_v2  ;;  %1994 = vmatprep.mubr.f32.mxu0 %v1890_v13  ;;  %v2064_v2 = vld [vmem:[%s3449_s6] ss:$0 sm:$0xff] }
 0x731   :  { %2067 = vmatprep.subr.mxu0 %v1921_v24 }
 0x732   :  { %2068 = vmatpush3.msra.mxu0 %v1905_v20 }
 0x733   :  { %2069 = vmatprep.subr.mxu0 %v1920_v21 }
 0x734   :  { %2070 = vmatpush3.msra.mxu0 %v1904_v27 }
 0x735   :  { %2071 = vmatprep.subr.mxu0 %v1919_v28 }
 0x736   :  { %2072 = vmatpush3.msra.mxu0 %v1903_v23 }
 0x737   :  { %2073 = vmatprep.subr.mxu0 %v1918_v44 }
 0x738   :  { %2074 = vmatpush3.msra.mxu0 %v1902_v22 }
 0x739   :  { %2075 = vmatprep.subr.mxu0 %v1917_v14 }
 0x73a   :  { %2076 = vmatpush3.msra.mxu0 %v1901_v40 }
 0x73b   :  { %2077 = vmatprep.subr.mxu0 %v1916_v1 }
 0x73c   :  { %2078 = vmatpush3.msra.mxu0 %v1900_v63 }
 0x73d   :  { %2079 = vmatprep.subr.mxu0 %v1915_v35 }
 0x73e   :  { %2080 = vmatpush3.msra.mxu0 %v1899_v29 }
 0x73f   :  { %2081 = vmatprep.subr.mxu0 %v1914_v53 }
 0x740   :  { %2082 = vmatpush3.msra.mxu0 %v1898_v11 }
 0x741   :  { %2083 = vmatprep.subr.mxu0 %v1913_v10 }
 0x742   :  { %2084 = vmatpush3.msra.mxu0 %v1897_v15 }
 0x743   :  { %2085 = vmatprep.subr.mxu0 %v1912_v5 }
 0x744   :  { %2086 = vmatpush3.msra.mxu0 %v1896_v8 }
 0x745   :  { %2087 = vmatprep.subr.mxu0 %v1911_v9 }
 0x746   :  { %2088 = vmatpush3.msra.mxu0 %v1895_v7 }
 0x747   :  { %2089 = vmatprep.subr.mxu0 %v1910_v4 }
 0x748   :  { %2090 = vmatpush3.msra.mxu0 %v1894_v12 }
 0x749   :  { %2091 = vmatprep.subr.mxu0 %v1909_v19 }
 0x74a   :  { %2092 = vmatpush3.msra.mxu0 %v1893_v18 }
 0x74b   :  { %2093 = vmatprep.subr.mxu0 %v1908_v26 }
 0x74c   :  { %2094 = vmatpush3.msra.mxu0 %v1892_v16 }
 0x74d   :  { %2095 = vmatprep.subr.mxu0 %v1907_v42 }
 0x74e   :  { %2096 = vmatpush3.msra.mxu0 %v1891_v43 }
 0x7ef   :  { %v1781_v45 = vpop.f32.mrf.mxu0  ;;  %v1852_v32 = vpop.f32.mrf.mxu1 }
 0x7f0   :  { %v1857_v62 = vadd.f32 %v1781_v45, %v3717_v46  ;;  %v1859_v17 = vadd.f32 %v1852_v32, %v3720_v39 }
 0x7f1   :  { %v1783_v0 = vpop.f32.mrf.mxu0  ;;  %v1854_v34 = vpop.f32.mrf.mxu1 }
 0x7f2   :  { %v2061_v6 = vmul.f32 -1.442695, %v1857_v62  ;;  %v1858_v31 = vadd.f32 %v1783_v0, %v3718_v30  ;;  %v1860_v37 = vadd.f32 %v1854_v34, %v3719_v36 }
 0x7f4   :  { %2221 = vpow2.f32 %v2061_v6  ;;  %v2062_v33 = vmul.f32 -1.442695, %v1858_v31  ;;  %v2063_v47 = vmul.f32 -1.442695, %v1860_v37 }
 0x7f6   :  { %2223 = vpow2.f32 %v2062_v33 }
 0x7f7   :  { %2225 = vtanh.f32 %v1859_v17 }
 0x7f8   :  { %2227 = vpow2.f32 %v2063_v47 }
 0x801   :  { %v2222_v48 = vpop.eup %2221 }
 0x802   :  { %v1864_v49 = vadd.f32 1.0, %v2222_v48 }
 0x803   :  { %v2224_v50 = vpop.eup %2223 }
 0x804   :  { %2229 = vrcp.f32 %v1864_v49  ;;  %v1870_v51 = vadd.f32 1.0, %v2224_v50  ;;  %v2226_v52 = vpop.eup %2225 }
 0x805   :  { %v2228_v54 = vpop.eup %2227 }
 0x806   :  { %2231 = vrcp.f32 %v1870_v51  ;;  %v1877_v58 = vadd.f32 1.0, %v2228_v54 }
 0x808   :  { %2233 = vrcp.f32 %v1877_v58 }
 0x811   :  { %v2230_v55 = vpop.eup %2229 }
 0x812   :  { %v1881_v56 = vmul.f32 %v2230_v55, %v2226_v52 }
 0x813   :  { %v2232_v57 = vpop.eup %2231 }
 0x814   :  { %v1880_v59 = vmul.f32 %v2232_v57, %v3426_v61 }
 0x815   :  { %v2234_v3 = vpop.eup %2233 }
 0x816   :  { %v1882_v60 = vadd.f32 %v1881_v56, %v1880_v59 }
 0x818   :  { %2235 = vtanh.f32 %v1882_v60 }
 0x825   :  { %v2236_v41 = vpop.eup %2235 }
 0x826   :  { %v1884_v25 = vmul.f32 %v2236_v41, %v2234_v3 }
 0x828   :  { %1995 = vmatmul.mubr.f32.vlgmr.msra.gmra.mxu0 %v1884_v25 }
 0x8e8   :  { %v2097_v38 = vpop.f32.mrf.mxu0 }
 0x8ea   :  { %v2098_v24 = vpop.f32.mrf.mxu0 }
 0x8eb   :  { %v2099_v20 = vadd.f32 %v2098_v24, %v2097_v38 }
 0x8ed   :  { %v1997_v21 = vadd.f32 %v2099_v20, %v2064_v2 }
 0x8ef   :  { %2000 = vst [vmem:[#allocation11] sm:$0xff] %v1997_v21 }
 0x8f0   :  { %2372 = shalt.err (!%p2369_p5)
}
 0x8f1   :  { %2010 = dma.vmem_to_hbm [thread:$0]  %s2008_s14, 128, %s3450_s7, [#allocation7]  }
 0x8f2   :  { %2385 = dma.done.wait [#allocation7], 128  }
 0x8f3   :  { %2386 = vsyncadd [#allocation7], 4294967168 }
 0x8f4   :  { %2014 = vsyncpa [#allocation6], 1 }
 0x8f5   :  { %2015 = vsyncpa [#allocation9], 1 }
 0x8f6   :  { %2016 = vsyncpa [#allocation7], 1 }

</bundles_post_ra>
